<compile_context>
chip_gen: v7x
topology: tpu7x:2x2x1
jax: 0.10.0
libtpu: 0.0.40
codegen_flags: <defaults>
</compile_context>

<pallas_src>
import numpy as np
import jax
import jax.numpy as jnp
from jax.experimental import pallas as pl
from jax.experimental.pallas import tpu as pltpu


# ---------------------------------------------------------------------------
# Hardware-aware budgets
# ---------------------------------------------------------------------------
def _physical_vmem_bytes():
    try:
        return int(pltpu.get_tpu_info().vmem_capacity_bytes)
    except Exception:
        return 64 * 1024 * 1024          # conservative fallback (v7x per-TC VMEM)


_PHYS_VMEM = _physical_vmem_bytes()
_VMEM_CAP = (_PHYS_VMEM * 3) // 4        # never request all of physical VMEM
_TARGET_TILE_BYTES = 8 * 1024 * 1024     # ~8 MiB input tile per grid step
_SMALL_EST_BYTES = 4 * 1024 * 1024       # per-tensor cutoff for the batched path
_BATCH_EST_BYTES = 8 * 1024 * 1024       # combined VMEM estimate per batched call


def _round_up(x, m):
    return ((x + m - 1) // m) * m


def _round_down(x, m):
    return max(m, (x // m) * m)


def _cdiv(a, b):
    return (a + b - 1) // b


def _acc_dtype_for(dtype):
    dtype = jnp.dtype(dtype)
    if jnp.issubdtype(dtype, jnp.floating):
        return jnp.promote_types(dtype, jnp.float32)
    if jnp.issubdtype(dtype, jnp.integer) or jnp.issubdtype(dtype, jnp.bool_):
        return jnp.promote_types(dtype, jnp.int32)
    return dtype


def _out_dtype_for(dtype):
    dtype = jnp.dtype(dtype)
    if jnp.issubdtype(dtype, jnp.floating) or jnp.issubdtype(dtype, jnp.complexfloating):
        return dtype
    # torch.sum promotes bool/int to int64; JAX defaults to 32-bit.
    # TODO(synk): emit int64 when jax_enable_x64 is on to match torch exactly.
    return _acc_dtype_for(dtype)


def _single_shot_estimate(d0, flat, dtype, acc_dtype, out_dtype):
    """Padded-VMEM estimate for a whole-array (batched) reduction of one tensor."""
    pr = _round_up(d0, 8)
    pf = _round_up(flat, 128)
    in_b = pr * pf * jnp.dtype(dtype).itemsize
    tmp_b = pr * pf * jnp.dtype(acc_dtype).itemsize \
        if jnp.dtype(acc_dtype) != jnp.dtype(dtype) else 0
    out_b = 8 * pf * jnp.dtype(out_dtype).itemsize
    return in_b + tmp_b + out_b


# ---------------------------------------------------------------------------
# Batched whole-array path (many small tensors, one pallas_call)
# ---------------------------------------------------------------------------
def _make_batched_kernel(n, acc_dtypes):
    def kernel(*refs):
        for i in range(n):
            x_ref, o_ref = refs[i], refs[n + i]
            xv = x_ref[...].astype(acc_dtypes[i])
            o_ref[...] = (jnp.sum(xv, axis=0, keepdims=True) * 2).astype(o_ref.dtype)
    return kernel


def _run_small_batch(entries, results):
    n = len(entries)
    kernel = _make_batched_kernel(n, [e["acc_dtype"] for e in entries])
    out_shape = tuple(
        jax.ShapeDtypeStruct((1, e["flat"]), e["out_dtype"]) for e in entries
    )
    est = sum(e["est"] for e in entries)
    vmem_limit = int(min(_VMEM_CAP, max(2 * est + (2 << 20), 16 * 1024 * 1024)))
    outs = pl.pallas_call(
        kernel,
        out_shape=out_shape,
        compiler_params=pltpu.CompilerParams(vmem_limit_bytes=vmem_limit),
    )(*[e["x2"] for e in entries])
    if not isinstance(outs, (tuple, list)):
        outs = (outs,)
    for e, o in zip(entries, outs):
        results[e["idx"]] = o.reshape(e["rest"])


# ---------------------------------------------------------------------------
# Tiled path (large tensors)
# ---------------------------------------------------------------------------
def _choose_tiles(d0, flat, itemsize, acc_itemsize, out_itemsize):
    r_full = _round_up(d0, 8)
    f_full = _round_up(flat, 128)

    # Lane-axis tile: grow towards the byte budget (assuming the minimum 8-row
    # reduction tile) so skewed shapes still get multi-MiB DMAs.
    f_cap = max(128, _round_down(_TARGET_TILE_BYTES // (8 * itemsize), 128))
    f_tile = min(f_full, f_cap)
    # Give the parallel (flat) axis >= 2 blocks so both TensorCores engage on
    # dual-core chips (v7x); near-free on single-core chips.
    if _cdiv(flat, f_tile) < 2 and f_full >= 256:
        f_tile = min(f_tile, _round_up(_cdiv(f_full, 2), 128))

    def r_for(f):
        return min(r_full, max(8, _round_down(_TARGET_TILE_BYTES // (f * itemsize), 8)))

    def need(r, f):
        in_b = 2 * r * f * itemsize          # double-buffered input tile
        tmp_b = 2 * r * f * acc_itemsize     # in-kernel cast/mask temporaries
        out_b = 2 * 8 * f * out_itemsize     # (1, f) output block pads to 8 sublanes
        acc_b = 8 * f * acc_itemsize         # scratch accumulator
        return in_b + tmp_b + out_b + acc_b + (2 << 20)

    r_tile = r_for(f_tile)
    # Shrink only if the estimate would blow the per-TC VMEM cap (v7x: 64 MiB).
    while need(r_tile, f_tile) > _VMEM_CAP:
        if r_tile > 8:
            r_tile = _round_down(max(8, r_tile // 2), 8)
        elif f_tile > 128:
            f_tile = _round_down(max(128, f_tile // 2), 128)
            r_tile = r_for(f_tile)
        else:
            break
    return r_tile, f_tile, need(r_tile, f_tile)


def _make_tiled_kernel(acc_dtype, d0, r_tile, f_tile, needs_row_mask):
    sub = r_tile // 8

    def _partial_sum(xv):
        # Sum over groups of 8 rows only (pure VPU adds, no cross-sublane XLU
        # work in the hot loop); the 8 -> 1 collapse happens once in finalize.
        return jnp.sum(xv.reshape(sub, 8, f_tile), axis=0)

    def kernel(x_ref, o_ref, acc_ref):
        r = pl.program_id(1)                  # reduction axis, innermost ("arbitrary")
        last = pl.num_programs(1) - 1

        @pl.when(r == 0)
        def _init():
            acc_ref[...] = jnp.zeros_like(acc_ref)

        if needs_row_mask:
            @pl.when(r != last)
            def _full():
                acc_ref[...] += _partial_sum(x_ref[...].astype(acc_dtype))

            @pl.when(r == last)
            def _tail():
                # Only the final row block is partial: mask out-of-range rows
                # here only, not on every step.
                xv = x_ref[...].astype(acc_dtype)
                row = jax.lax.broadcasted_iota(jnp.int32, xv.shape, 0) + r * r_tile
                xv = jnp.where(row < d0, xv, jnp.zeros_like(xv))
                acc_ref[...] += _partial_sum(xv)
        else:
            acc_ref[...] += _partial_sum(x_ref[...].astype(acc_dtype))

        @pl.when(r == last)
        def _finalize():
            total = jnp.sum(acc_ref[...], axis=0, keepdims=True)
            o_ref[...] = (total * 2).astype(o_ref.dtype)   # *2 folded into the store

    return kernel


def _sum_dim0_times2_tiled(x2, d0, flat, acc_dtype, out_dtype):
    itemsize = jnp.dtype(x2.dtype).itemsize
    acc_it = jnp.dtype(acc_dtype).itemsize
    out_it = jnp.dtype(out_dtype).itemsize

    r_tile, f_tile, need = _choose_tiles(d0, flat, itemsize, acc_it, out_it)
    needs_row_mask = (d0 % r_tile) != 0
    grid = (_cdiv(flat, f_tile), _cdiv(d0, r_tile))
    vmem_limit = int(min(_VMEM_CAP, max(need, 16 * 1024 * 1024)))

    return pl.pallas_call(
        _make_tiled_kernel(acc_dtype, d0, r_tile, f_tile, needs_row_mask),
        out_shape=jax.ShapeDtypeStruct((1, flat), out_dtype),
        grid=grid,
        in_specs=[pl.BlockSpec((r_tile, f_tile), lambda j, r: (r, j))],
        out_specs=pl.BlockSpec((1, f_tile), lambda j, r: (0, j)),
        scratch_shapes=[pltpu.VMEM((8, f_tile), acc_dtype)],
        compiler_params=pltpu.CompilerParams(
            dimension_semantics=("parallel", "arbitrary"),
            vmem_limit_bytes=vmem_limit,
        ),
    )(x2)


# ---------------------------------------------------------------------------
# Module forward: list-in, list-out
# ---------------------------------------------------------------------------
def pt_module_forward(inputs):
    results = [None] * len(inputs)
    small = []

    for idx, x in enumerate(inputs):
        d0 = x.shape[0]
        rest = x.shape[1:]
        flat = int(np.prod(rest)) if rest else 1
        out_dtype = _out_dtype_for(x.dtype)

        if d0 == 0 or flat == 0:
            results[idx] = jnp.zeros(rest, out_dtype)
            continue

        acc_dtype = _acc_dtype_for(x.dtype)
        x2 = x.reshape(d0, flat)
        est = _single_shot_estimate(d0, flat, x.dtype, acc_dtype, out_dtype)

        if est <= _SMALL_EST_BYTES:
            small.append(dict(idx=idx, x2=x2, flat=flat, rest=rest,
                              acc_dtype=acc_dtype, out_dtype=out_dtype, est=est))
        else:
            out = _sum_dim0_times2_tiled(x2, d0, flat, acc_dtype, out_dtype)
            results[idx] = out.reshape(rest)

    # Flush the small tensors in VMEM-budgeted batches (one pallas_call each),
    # amortizing the per-call launch overhead across the whole list.
    batch, batch_est = [], 0
    for e in small:
        if batch and batch_est + e["est"] > _BATCH_EST_BYTES:
            _run_small_batch(batch, results)
            batch, batch_est = [], 0
        batch.append(e)
        batch_est += e["est"]
    if batch:
        _run_small_batch(batch, results)

    return results


def sum_dim0_times2(x):
    """Single-tensor convenience wrapper."""
    return pt_module_forward([x])[0]


if __name__ == "__main__":
    key = jax.random.PRNGKey(0)
    keys = jax.random.split(key, 6)

    inputs = [
        jax.random.normal(keys[0], (2, 4, 16, 16), dtype=jnp.float32),   # batched small path
        jax.random.normal(keys[1], (3, 8, 32), dtype=jnp.float32),       # batched small path
        jax.random.normal(keys[2], (5, 16), dtype=jnp.float32),          # batched small path
        jax.random.normal(keys[3], (1040, 3, 512), dtype=jnp.float32),   # tiled, 2 parallel blocks
        jax.random.normal(keys[4], (9000, 700), dtype=jnp.float32),      # tiled, partial row+lane blocks
        jax.random.normal(keys[5], (5, 300000), dtype=jnp.float32),      # tiled, wide-skew, masked tail rows
    ]

    outs = pt_module_forward(inputs)
    outs = [jax.block_until_ready(o) for o in outs]

    for x, o in zip(inputs, outs):
        ref = jnp.sum(x, axis=0) * 2.0
        np.testing.assert_allclose(np.asarray(o), np.asarray(ref), rtol=2e-5, atol=5e-3)

    print("KERNEL_OK")
</pallas_src>

<mosaic_0001>
module attributes {stable_mosaic.version = 11 : i64} {
  func.func @kernel(%arg0: i32, %arg1: i32, %arg2: memref<1040x768xf32, #tpu.memory_space<vmem>>, %arg3: memref<1x768xf32, #tpu.memory_space<vmem>>, %arg4: memref<8x768xf32, #tpu.memory_space<vmem>>) attributes {dimension_semantics = [#tpu.dimension_semantics<parallel>, #tpu.dimension_semantics<arbitrary>], iteration_bounds = array<i64: 2, 1>, scalar_prefetch = 0 : i64, scratch_operands = 1 : i64, tpu.core_type = #tpu.core_type<tc>, window_params = [{transform_indices = @transform_0, window_bounds = array<i64: 1040, 768>}, {transform_indices = @transform_1, window_bounds = array<i64: 1, 768>}]} {
    %c0_i32 = arith.constant 0 : i32
    %0 = arith.cmpi eq, %arg1, %c0_i32 : i32
    %1 = arith.extui %0 : i1 to i32
    %c0_i32_0 = arith.constant 0 : i32
    %2 = arith.cmpi ne, %1, %c0_i32_0 : i32
    scf.if %2 {
      %cst_8 = arith.constant 0.000000e+00 : f32
      %12 = vector.broadcast %cst_8 : f32 to vector<8x768xf32>
      %c0_9 = arith.constant 0 : index
      %c0_10 = arith.constant 0 : index
      %13 = vector.load %arg4[%c0_9, %c0_10] : memref<8x768xf32, #tpu.memory_space<vmem>>, vector<8x768xf32>
      tpu.vector_store %arg4[%c0_9, %c0_10], %12 {strides = array<i32>} : memref<8x768xf32, #tpu.memory_space<vmem>>, vector<8x768xf32>,
    } else {
    }
    %c0 = arith.constant 0 : index
    %c0_1 = arith.constant 0 : index
    %3 = vector.load %arg4[%c0, %c0_1] : memref<8x768xf32, #tpu.memory_space<vmem>>, vector<8x768xf32>
    %c0_2 = arith.constant 0 : index
    %c0_3 = arith.constant 0 : index
    %4 = vector.load %arg2[%c0_2, %c0_3] : memref<1040x768xf32, #tpu.memory_space<vmem>>, vector<1040x768xf32>
    %5 = vector.shape_cast %4 : vector<1040x768xf32> to vector<130x8x768xf32>
    %cst = arith.constant dense<0.000000e+00> : vector<8x768xf32>
    %6 = vector.multi_reduction <add>, %5, %cst [0] : vector<130x8x768xf32> to vector<8x768xf32>
    %7 = arith.addf %3, %6 : vector<8x768xf32>
    %c0_4 = arith.constant 0 : index
    %c0_5 = arith.constant 0 : index
    %8 = vector.load %arg4[%c0_4, %c0_5] : memref<8x768xf32, #tpu.memory_space<vmem>>, vector<8x768xf32>
    tpu.vector_store %arg4[%c0_4, %c0_5], %7 {strides = array<i32>} : memref<8x768xf32, #tpu.memory_space<vmem>>, vector<8x768xf32>,
    %c0_i32_6 = arith.constant 0 : i32
    %9 = arith.cmpi eq, %arg1, %c0_i32_6 : i32
    %10 = arith.extui %9 : i1 to i32
    %c0_i32_7 = arith.constant 0 : i32
    %11 = arith.cmpi ne, %10, %c0_i32_7 : i32
    scf.if %11 {
      %c0_8 = arith.constant 0 : index
      %c0_9 = arith.constant 0 : index
      %12 = vector.load %arg4[%c0_8, %c0_9] : memref<8x768xf32, #tpu.memory_space<vmem>>, vector<8x768xf32>
      %cst_10 = arith.constant dense<0.000000e+00> : vector<768xf32>
      %13 = vector.multi_reduction <add>, %12, %cst_10 [0] : vector<8x768xf32> to vector<768xf32>
      %14 = vector.shape_cast %13 : vector<768xf32> to vector<1x768xf32>
      %cst_11 = arith.constant 2.000000e+00 : f32
      %15 = vector.broadcast %cst_11 : f32 to vector<1x768xf32>
      %16 = arith.mulf %14, %15 : vector<1x768xf32>
      %c0_12 = arith.constant 0 : index
      %c0_13 = arith.constant 0 : index
      %17 = vector.load %arg3[%c0_12, %c0_13] : memref<1x768xf32, #tpu.memory_space<vmem>>, vector<1x768xf32>
      tpu.vector_store %arg3[%c0_12, %c0_13], %16 {strides = array<i32>} : memref<1x768xf32, #tpu.memory_space<vmem>>, vector<1x768xf32>,
    } else {
    }
    return
  }
  func.func @transform_0(%arg0: i32, %arg1: i32) -> (i32, i32) {
    %c0_i32 = arith.constant 0 : i32
    return %arg1, %arg0 : i32, i32
  }
  func.func @transform_1(%arg0: i32, %arg1: i32) -> (i32, i32) {
    %c0_i32 = arith.constant 0 : i32
    %c0_i32_0 = arith.constant 0 : i32
    return %c0_i32, %arg0 : i32, i32
  }
}

</mosaic_0001>

<bundles_post_ra>
// kernel: tpu_custom_call.1
= control target key start
LH: loop header
LB: loop body
LE: loop exit
PB: predicated region body
PF: predicated region fallthrough
CT: control target
= control target key end

     0   :  { %6 = vsyncpa [#allocation4], 0  ;;  %s3100_s0 = inlined_call_operand.hbm [shape: f32[1040,1536], index: 0, kind: input, shape index: {}]   ;;  %s3101_s1 = inlined_call_operand.hbm [shape: f32[1,1536], index: 1, kind: output, shape index: {}]  }
   0x1   :  { %8 = vsyncpa [#allocation4 + $0x1], 0 }
   0x2   :  { %9 = vsyncpa [#allocation5], 0 }
   0x3   :  { %11 = vsyncpa [#allocation5 + $0x1], 0  ;;  %s2146_s6 = smov 0   ;;  %s2148_s7 = smov 0  }
   0x4   :  { %s2150_s8 = smov 0   ;;  %s2152_s9 = smov 0  }
   0x5   :  { %s2154_s10 = smov 0   ;;  %s2156_s11 = smov 0  }
   0x6 LB: > { %s1936_s12 = sadd.s32 4294967295, %s2128_s11   ;;  %s1937_s13 = sadd.s32 4294967294, %s2128_s11   ;;  %s2128_s11 = sphi %s2156_s11, %s17_s11   ;;  %s2124_s10 = sphi %s2154_s10, %s3115_s10   ;;  %s2120_s9 = sphi %s2152_s9, %s3114_s9   ;;  %s2116_s8 = sphi %s2150_s8, %s3113_s8   ;;  %s2112_s7 = sphi %s2148_s7, %s3112_s7   ;;  %s2108_s6 = sphi %s2146_s6, %s3111_s6  }
   0x7   : > { %s29_s14 = sadd.s32 1, %s2124_s10  ;;  %s38_s15 = sadd.s32 1, %s2116_s8 }
   0x8   : > { %p31_p0 = scmp.ge.s32.totalorder %s29_s14, 2  ;;  %p45_p1 = scmp.ne.s32.totalorder %s2116_s8, %s2112_s7 }
   0x9   : > { %p46_p2 = scmp.eq.s32.totalorder %s2128_s11, 0  ;;  %p51_p3 = scmp.ne.s32.totalorder %s2112_s7, %s2108_s6 }
   0xa   : > { %s3117_s14 = smov (%p31_p0, %s29_s14), 0  ;;  %p52_p5 = scmp.eq.s32.totalorder %s1936_s12, 0 }
   0xb   : > { %p2187_p4 = por %p46_p2, %p45_p1  ;;  %s34_s17 = ssub.s32 %s2124_s10, %s3117_s14 }
   0xc   : > { %p75_p6 = scmp.eq.s32.totalorder %s1936_s12, 1  ;;  %p36_p7 = scmp.eq.s32.totalorder %s34_s17, 0 }
   0xd   : > { %p2193_p8 = por %p52_p5, %p51_p3  ;;  %p81_p10 = scmp.eq.s32.totalorder %s1937_s13, 1 }
   0xe   : > { %p2197_p9 = por %p75_p6, %p45_p1  ;;  %p1962_p13 = scmp.lt.s32.totalorder %s2128_s11, 2 }
   0xf   : > { %s2202_s20 = scalar_select %p36_p7, %s2116_s8, %s38_s15  }
  0x10   : > { %s3105_s19 = scalar_select %p2197_p9, 1, 0 }
  0x11   : > { %p2204_p11 = por %p81_p10, %p51_p3  ;;  %s101_s22 = sand.u32 1, %s2116_s8  }
  0x12   : > { %s1947_s23 = smul.u32 6240, %s101_s22  ;;  %p2214_p0 = pnand %p1962_p13, %p2187_p4 }
  0x13   : > { %s3106_s21 = scalar_select %p2204_p11, 1, 0 }
  0x14   : > { %s1945_s24 = smul.u32 768, %s2124_s10  ;;  %s105_s29 = scalar_lea.vmem [#allocation3], %s1947_s23 }
  0x15   : > { %s115_s30 = sshll.u32 %s105_s29, 4  ;;  %s2225_s2 = scalar_lea.sflag [#allocation4], %s101_s22  ;;  %s2223_s30 = int_to_ptr.vmem [resolvable:$true] %s115_s30 }
  0x16   : > { %s2221_s28 = scalar_lea.hbm %s3100_s0, %s1945_s24  ;;  %p2018_p2 = pneg %p2214_p0 }
  0x17   : > { %s2016_s3 = scalar_lea.hbm %s2221_s28, 99840  ;;  %s2021_s12 = scalar_lea.hbm %s3100_s0, 199680 }
  0x18   : > { %p2017_p1 = scmp.ne.s32.totalorder %s2221_s28, %s2016_s3  ;;  %p2022_p5 = scmp.lt.u32.totalorder %s2221_s28, %s3100_s0 }
  0x19   : > { %p2023_p6 = scmp.lt.u32.totalorder %s2021_s12, %s2016_s3  ;;  %p2025_p10 = scmp.lt.u32.totalorder %s2016_s3, %s2221_s28 }
  0x1a   : > { %p2019_p3 = pnand %p2018_p2, %p2017_p1 }
  0x1b   : > { %p2024_p7 = por %p2023_p6, %p2022_p5 }
  0x1c   : > { %p2020_p4 = pneg %p2019_p3 }
  0x1d   : > { %p2026_p13 = por %p2025_p10, %p2024_p7 }
  0x1f   : > { %p2027_p12 = pnand %p2026_p13, %p2020_p4 }
  0x21   : > { %2030 = shalt.err (!%p2027_p12)
}
  0x22   : > { %s2031_s16 = scalar_lea.vmem %s2223_s30, 99840  ;;  %s2130_s17 = smov [#allocation3]  }
  0x23   : > { %p2032_p1 = scmp.ne.s32.totalorder %s2223_s30, %s2031_s16  ;;  %s2036_s22 = sshll.u32 %s2130_s17, 4  ;;  %s2037_s22 = int_to_ptr.vmem [resolvable:$false] %s2036_s22 }
  0x24   : > { %s2038_s23 = scalar_lea.vmem %s2037_s22, 199680  ;;  %p2039_p9 = scmp.lt.s32.totalorder %s2223_s30, %s2037_s22 }
  0x25   : > { %p2034_p3 = pnand %p2032_p1, %p2018_p2  ;;  %p2040_p5 = scmp.lt.s32.totalorder %s2038_s23, %s2031_s16 }
  0x27   : > { %p2035_p11 = pneg %p2034_p3  ;;  %p2041_p6 = por %p2040_p5, %p2039_p9 }
  0x29   : > { %p2042_p7 = pnand %p2041_p6, %p2035_p11 }
  0x2b   : > { %2045 = shalt.err (!%p2042_p7)
}
  0x2c   : > { %s2131_s24 = smov 1536   ;;  %s2132_s26 = smov 768  }
  0x2d   : > { %s2133_s27 = smov 48   ;;  %p1941_p12 = scmp.ge.s32.totalorder %s2128_s11, 1 }
  0x2e   : > { %1957 = dma.hbm_to_vmem [thread:$0]  (!%p2214_p0), %s2221_s28, 99840, %s2223_s30, %s2225_s2, %s2131_s24, %s2132_s26, %s2133_s27  }
  0x2f   : > { %p123_p2 = scmp.lt.s32.totalorder %s2128_s11, 3 }
  0x31   : > { %p124_p4 = pnand %p1941_p12, %p123_p2 }
  0x32   : > { %s2256_s29 = sand.u32 (!%p124_p4), 1, %s2112_s7  }
  0x33   : > { %127 = sbr.rel (%p124_p4) target bundleno = 359 (0x167), region = 24  ;;  %s130_s4 = scalar_lea.sflag (!%p124_p4), [#allocation4], %s2256_s29 }
  0x34   : > { %s1948_s3 = smul.u32 (!%p124_p4), 6240, %s2256_s29 }
  0x36   : > { %s2260_s5 = scalar_lea.vmem (!%p124_p4), [#allocation3], %s1948_s3 }
  0x3a   : > { %2099 = dma.done.wait (%p2193_p8), %s130_s4, 99840  }
  0x3b   : > { %2101 = vsyncadd (%p2193_p8), %s130_s4, 4294867456  ;;  %v171_v0 = vld [vmem:[%s2260_s5] sm:$0xff]  ;;  %v172_v1 = vld [vmem:[%s2260_s5 + $0x8] sm:$0xff]  ;;  %s1949_s18 = smul.u32 6, %s2256_s29  ;;  %s1841_s15 = scalar_lea.sflag [#allocation5], %s2256_s29 }
  0x3c   : > { %v173_v2 = vld [vmem:[%s2260_s5 + $0x10] sm:$0xff]  ;;  %v174_v3 = vld [vmem:[%s2260_s5 + $0x18] sm:$0xff]  ;;  %v175_v4 = vld [vmem:[%s2260_s5 + $0x20] sm:$0xff]  ;;  %s1946_s25 = smul.u32 96, %s2120_s9  ;;  %p3108_p9 = scmp.ne.s32.totalorder %s3105_s19, 0 }
  0x3d   : > { %v176_v5 = vld [vmem:[%s2260_s5 + $0x28] sm:$0xff]  ;;  %v177_v6 = vld [vmem:[%s2260_s5 + $0x30] sm:$0xff]  ;;  %v178_v7 = vld [vmem:[%s2260_s5 + $0x38] sm:$0xff]  ;;  %s151_s28 = scalar_lea.vmem [#allocation6], %s1949_s18  ;;  %s2135_s9 = smov [#allocation6]  }
  0x3e   : > { %v179_v8 = vld [vmem:[%s2260_s5 + $0x40] sm:$0xff]  ;;  %v180_v9 = vld [vmem:[%s2260_s5 + $0x48] sm:$0xff]  ;;  %v181_v10 = vld [vmem:[%s2260_s5 + $0x50] sm:$0xff]  ;;  %v951_v12 = vadd.f32 %v177_v6, %v171_v0  ;;  %v1080_v13 = vadd.f32 %v178_v7, %v172_v1  ;;  %s1855_s30 = sshll.u32 %s151_s28, 4  ;;  %s3051_s13 = scalar_lea.hbm %s3101_s1, %s1946_s25  ;;  %s3053_s30 = int_to_ptr.vmem [resolvable:$true] %s1855_s30 }
  0x3f   : > { %v182_v11 = vld [vmem:[%s2260_s5 + $0x58] sm:$0xff]  ;;  %v1209_v14 = vadd.f32 %v179_v8, %v173_v2  ;;  %v183_v15 = vld [vmem:[%s2260_s5 + $0x60] sm:$0xff]  ;;  %v184_v16 = vld [vmem:[%s2260_s5 + $0x68] sm:$0xff]  ;;  %v1338_v18 = vadd.f32 %v180_v9, %v174_v3  ;;  %v1467_v19 = vadd.f32 %v181_v10, %v175_v4  ;;  %s2046_s16 = scalar_lea.vmem %s3053_s30, 96  ;;  %s2050_s17 = sshll.u32 %s2135_s9, 4  ;;  %s2051_s17 = int_to_ptr.vmem [resolvable:$false] %s2050_s17 }
  0x40   : > { %v185_v17 = vld [vmem:[%s2260_s5 + $0x70] sm:$0xff]  ;;  %v1596_v20 = vadd.f32 %v182_v11, %v176_v5  ;;  %v186_v21 = vld [vmem:[%s2260_s5 + $0x78] sm:$0xff]  ;;  %v187_v22 = vld [vmem:[%s2260_s5 + $0x80] sm:$0xff]  ;;  %v952_v24 = vadd.f32 %v951_v12, %v183_v15  ;;  %v1081_v25 = vadd.f32 %v1080_v13, %v184_v16  ;;  %p2047_p8 = scmp.ne.s32.totalorder %s3053_s30, %s2046_s16  ;;  %s2052_s22 = scalar_lea.vmem %s2051_s17, 192 }
  0x41   : > { %v188_v23 = vld [vmem:[%s2260_s5 + $0x88] sm:$0xff]  ;;  %v1210_v26 = vadd.f32 %v1209_v14, %v185_v17  ;;  %v189_v27 = vld [vmem:[%s2260_s5 + $0x90] sm:$0xff]  ;;  %v190_v28 = vld [vmem:[%s2260_s5 + $0x98] sm:$0xff]  ;;  %v1339_v30 = vadd.f32 %v1338_v18, %v186_v21  ;;  %v1468_v31 = vadd.f32 %v1467_v19, %v187_v22  ;;  %p2053_p10 = scmp.lt.s32.totalorder %s3053_s30, %s2051_s17  ;;  %p2054_p13 = scmp.lt.s32.totalorder %s2052_s22, %s2046_s16 }
  0x42   : > { %v191_v29 = vld [vmem:[%s2260_s5 + $0xa0] sm:$0xff]  ;;  %v1597_v32 = vadd.f32 %v1596_v20, %v188_v23  ;;  %v192_v33 = vld [vmem:[%s2260_s5 + $0xa8] sm:$0xff]  ;;  %v193_v34 = vld [vmem:[%s2260_s5 + $0xb0] sm:$0xff]  ;;  %v953_v36 = vadd.f32 %v952_v24, %v189_v27  ;;  %v1082_v37 = vadd.f32 %v1081_v25, %v190_v28  ;;  %p2048_p11 = pnand %p2047_p8, %p3108_p9 }
  0x43   : > { %v194_v35 = vld [vmem:[%s2260_s5 + $0xb8] sm:$0xff]  ;;  %v1211_v38 = vadd.f32 %v1210_v26, %v191_v29  ;;  %v195_v39 = vld [vmem:[%s2260_s5 + $0xc0] sm:$0xff]  ;;  %v196_v40 = vld [vmem:[%s2260_s5 + $0xc8] sm:$0xff]  ;;  %v1340_v42 = vadd.f32 %v1339_v30, %v192_v33  ;;  %v1469_v43 = vadd.f32 %v1468_v31, %v193_v34  ;;  %p2055_p1 = por %p2054_p13, %p2053_p10 }
  0x44   : > { %v197_v41 = vld [vmem:[%s2260_s5 + $0xd0] sm:$0xff]  ;;  %v1598_v44 = vadd.f32 %v1597_v32, %v194_v35  ;;  %v198_v45 = vld [vmem:[%s2260_s5 + $0xd8] sm:$0xff]  ;;  %v199_v46 = vld [vmem:[%s2260_s5 + $0xe0] sm:$0xff]  ;;  %v954_v48 = vadd.f32 %v953_v36, %v195_v39  ;;  %v1083_v49 = vadd.f32 %v1082_v37, %v196_v40  ;;  %p2049_p0 = pneg %p2048_p11 }
  0x45   : > { %v200_v47 = vld [vmem:[%s2260_s5 + $0xe8] sm:$0xff]  ;;  %v1212_v50 = vadd.f32 %v1211_v38, %v197_v41  ;;  %v201_v51 = vld [vmem:[%s2260_s5 + $0xf0] sm:$0xff]  ;;  %v202_v52 = vld [vmem:[%s2260_s5 + $0xf8] sm:$0xff]  ;;  %v1341_v54 = vadd.f32 %v1340_v42, %v198_v45  ;;  %v1470_v55 = vadd.f32 %v1469_v43, %v199_v46 }
  0x46   : > { %v203_v53 = vld [vmem:[%s2260_s5 + $0x100] sm:$0xff]  ;;  %v1599_v56 = vadd.f32 %v1598_v44, %v200_v47  ;;  %v204_v57 = vld [vmem:[%s2260_s5 + $0x108] sm:$0xff]  ;;  %v205_v58 = vld [vmem:[%s2260_s5 + $0x110] sm:$0xff]  ;;  %v955_v60 = vadd.f32 %v954_v48, %v201_v51  ;;  %v1084_v61 = vadd.f32 %v1083_v49, %v202_v52  ;;  %p2056_p3 = pnand %p2055_p1, %p2049_p0 }
  0x47   : > { %v206_v59 = vld [vmem:[%s2260_s5 + $0x118] sm:$0xff]  ;;  %v1213_v62 = vadd.f32 %v1212_v50, %v203_v53  ;;  %v207_v63 = vld [vmem:[%s2260_s5 + $0x120] sm:$0xff]  ;;  %v208_v0 = vld [vmem:[%s2260_s5 + $0x128] sm:$0xff]  ;;  %v1342_v2 = vadd.f32 %v1341_v54, %v204_v57  ;;  %v1471_v3 = vadd.f32 %v1470_v55, %v205_v58 }
  0x48   : > { %v209_v1 = vld [vmem:[%s2260_s5 + $0x130] sm:$0xff]  ;;  %v1600_v4 = vadd.f32 %v1599_v56, %v206_v59  ;;  %v210_v5 = vld [vmem:[%s2260_s5 + $0x138] sm:$0xff]  ;;  %v211_v6 = vld [vmem:[%s2260_s5 + $0x140] sm:$0xff]  ;;  %v956_v8 = vadd.f32 %v955_v60, %v207_v63  ;;  %v1085_v9 = vadd.f32 %v1084_v61, %v208_v0 }
  0x49   : > { %v212_v7 = vld [vmem:[%s2260_s5 + $0x148] sm:$0xff]  ;;  %v1214_v10 = vadd.f32 %v1213_v62, %v209_v1  ;;  %v213_v11 = vld [vmem:[%s2260_s5 + $0x150] sm:$0xff]  ;;  %v214_v12 = vld [vmem:[%s2260_s5 + $0x158] sm:$0xff]  ;;  %v1343_v14 = vadd.f32 %v1342_v2, %v210_v5  ;;  %v1472_v15 = vadd.f32 %v1471_v3, %v211_v6 }
  0x4a   : > { %v215_v13 = vld [vmem:[%s2260_s5 + $0x160] sm:$0xff]  ;;  %v1601_v16 = vadd.f32 %v1600_v4, %v212_v7  ;;  %v216_v17 = vld [vmem:[%s2260_s5 + $0x168] sm:$0xff]  ;;  %v217_v18 = vld [vmem:[%s2260_s5 + $0x170] sm:$0xff]  ;;  %v957_v20 = vadd.f32 %v956_v8, %v213_v11  ;;  %v1086_v21 = vadd.f32 %v1085_v9, %v214_v12 }
  0x4b   : > { %v218_v19 = vld [vmem:[%s2260_s5 + $0x178] sm:$0xff]  ;;  %v1215_v22 = vadd.f32 %v1214_v10, %v215_v13  ;;  %v219_v23 = vld [vmem:[%s2260_s5 + $0x180] sm:$0xff]  ;;  %v220_v24 = vld [vmem:[%s2260_s5 + $0x188] sm:$0xff]  ;;  %v1344_v26 = vadd.f32 %v1343_v14, %v216_v17  ;;  %v1473_v27 = vadd.f32 %v1472_v15, %v217_v18 }
  0x4c   : > { %v221_v25 = vld [vmem:[%s2260_s5 + $0x190] sm:$0xff]  ;;  %v1602_v28 = vadd.f32 %v1601_v16, %v218_v19  ;;  %v222_v29 = vld [vmem:[%s2260_s5 + $0x198] sm:$0xff]  ;;  %v223_v30 = vld [vmem:[%s2260_s5 + $0x1a0] sm:$0xff]  ;;  %v958_v32 = vadd.f32 %v957_v20, %v219_v23  ;;  %v1087_v33 = vadd.f32 %v1086_v21, %v220_v24 }
  0x4d   : > { %v224_v31 = vld [vmem:[%s2260_s5 + $0x1a8] sm:$0xff]  ;;  %v1216_v34 = vadd.f32 %v1215_v22, %v221_v25  ;;  %v225_v35 = vld [vmem:[%s2260_s5 + $0x1b0] sm:$0xff]  ;;  %v226_v36 = vld [vmem:[%s2260_s5 + $0x1b8] sm:$0xff]  ;;  %v1345_v38 = vadd.f32 %v1344_v26, %v222_v29  ;;  %v1474_v39 = vadd.f32 %v1473_v27, %v223_v30 }
  0x4e   : > { %v227_v37 = vld [vmem:[%s2260_s5 + $0x1c0] sm:$0xff]  ;;  %v1603_v40 = vadd.f32 %v1602_v28, %v224_v31  ;;  %v228_v41 = vld [vmem:[%s2260_s5 + $0x1c8] sm:$0xff]  ;;  %v229_v42 = vld [vmem:[%s2260_s5 + $0x1d0] sm:$0xff]  ;;  %v959_v44 = vadd.f32 %v958_v32, %v225_v35  ;;  %v1088_v45 = vadd.f32 %v1087_v33, %v226_v36 }
  0x4f   : > { %v230_v43 = vld [vmem:[%s2260_s5 + $0x1d8] sm:$0xff]  ;;  %v1217_v46 = vadd.f32 %v1216_v34, %v227_v37  ;;  %v231_v47 = vld [vmem:[%s2260_s5 + $0x1e0] sm:$0xff]  ;;  %v232_v48 = vld [vmem:[%s2260_s5 + $0x1e8] sm:$0xff]  ;;  %v1346_v50 = vadd.f32 %v1345_v38, %v228_v41  ;;  %v1475_v51 = vadd.f32 %v1474_v39, %v229_v42 }
  0x50   : > { %v233_v49 = vld [vmem:[%s2260_s5 + $0x1f0] sm:$0xff]  ;;  %v1604_v52 = vadd.f32 %v1603_v40, %v230_v43  ;;  %v234_v53 = vld [vmem:[%s2260_s5 + $0x1f8] sm:$0xff]  ;;  %v235_v54 = vld [vmem:[%s2260_s5 + $0x200] sm:$0xff]  ;;  %v960_v56 = vadd.f32 %v959_v44, %v231_v47  ;;  %v1089_v57 = vadd.f32 %v1088_v45, %v232_v48 }
  0x51   : > { %v236_v55 = vld [vmem:[%s2260_s5 + $0x208] sm:$0xff]  ;;  %v1218_v58 = vadd.f32 %v1217_v46, %v233_v49  ;;  %v237_v59 = vld [vmem:[%s2260_s5 + $0x210] sm:$0xff]  ;;  %v238_v60 = vld [vmem:[%s2260_s5 + $0x218] sm:$0xff]  ;;  %v1347_v62 = vadd.f32 %v1346_v50, %v234_v53  ;;  %v1476_v63 = vadd.f32 %v1475_v51, %v235_v54 }
  0x52   : > { %v239_v61 = vld [vmem:[%s2260_s5 + $0x220] sm:$0xff]  ;;  %v1605_v0 = vadd.f32 %v1604_v52, %v236_v55  ;;  %v240_v1 = vld [vmem:[%s2260_s5 + $0x228] sm:$0xff]  ;;  %v241_v2 = vld [vmem:[%s2260_s5 + $0x230] sm:$0xff]  ;;  %v961_v4 = vadd.f32 %v960_v56, %v237_v59  ;;  %v1090_v5 = vadd.f32 %v1089_v57, %v238_v60 }
  0x53   : > { %v242_v3 = vld [vmem:[%s2260_s5 + $0x238] sm:$0xff]  ;;  %v1219_v6 = vadd.f32 %v1218_v58, %v239_v61  ;;  %v243_v7 = vld [vmem:[%s2260_s5 + $0x240] sm:$0xff]  ;;  %v244_v8 = vld [vmem:[%s2260_s5 + $0x248] sm:$0xff]  ;;  %v1348_v10 = vadd.f32 %v1347_v62, %v240_v1  ;;  %v1477_v11 = vadd.f32 %v1476_v63, %v241_v2 }
  0x54   : > { %v245_v9 = vld [vmem:[%s2260_s5 + $0x250] sm:$0xff]  ;;  %v1606_v12 = vadd.f32 %v1605_v0, %v242_v3  ;;  %v246_v13 = vld [vmem:[%s2260_s5 + $0x258] sm:$0xff]  ;;  %v247_v14 = vld [vmem:[%s2260_s5 + $0x260] sm:$0xff]  ;;  %v962_v16 = vadd.f32 %v961_v4, %v243_v7  ;;  %v1091_v17 = vadd.f32 %v1090_v5, %v244_v8 }
  0x55   : > { %v248_v15 = vld [vmem:[%s2260_s5 + $0x268] sm:$0xff]  ;;  %v1220_v18 = vadd.f32 %v1219_v6, %v245_v9  ;;  %v249_v19 = vld [vmem:[%s2260_s5 + $0x270] sm:$0xff]  ;;  %v250_v20 = vld [vmem:[%s2260_s5 + $0x278] sm:$0xff]  ;;  %v1349_v22 = vadd.f32 %v1348_v10, %v246_v13  ;;  %v1478_v23 = vadd.f32 %v1477_v11, %v247_v14 }
  0x56   : > { %v251_v21 = vld [vmem:[%s2260_s5 + $0x280] sm:$0xff]  ;;  %v1607_v24 = vadd.f32 %v1606_v12, %v248_v15  ;;  %v252_v25 = vld [vmem:[%s2260_s5 + $0x288] sm:$0xff]  ;;  %v253_v26 = vld [vmem:[%s2260_s5 + $0x290] sm:$0xff]  ;;  %v963_v28 = vadd.f32 %v962_v16, %v249_v19  ;;  %v1092_v29 = vadd.f32 %v1091_v17, %v250_v20 }
  0x57   : > { %v254_v27 = vld [vmem:[%s2260_s5 + $0x298] sm:$0xff]  ;;  %v1221_v30 = vadd.f32 %v1220_v18, %v251_v21  ;;  %v255_v31 = vld [vmem:[%s2260_s5 + $0x2a0] sm:$0xff]  ;;  %v256_v32 = vld [vmem:[%s2260_s5 + $0x2a8] sm:$0xff]  ;;  %v1350_v34 = vadd.f32 %v1349_v22, %v252_v25  ;;  %v1479_v35 = vadd.f32 %v1478_v23, %v253_v26 }
  0x58   : > { %v257_v33 = vld [vmem:[%s2260_s5 + $0x2b0] sm:$0xff]  ;;  %v1608_v36 = vadd.f32 %v1607_v24, %v254_v27  ;;  %v258_v37 = vld [vmem:[%s2260_s5 + $0x2b8] sm:$0xff]  ;;  %v259_v38 = vld [vmem:[%s2260_s5 + $0x2c0] sm:$0xff]  ;;  %v964_v40 = vadd.f32 %v963_v28, %v255_v31  ;;  %v1093_v41 = vadd.f32 %v1092_v29, %v256_v32 }
  0x59   : > { %v260_v39 = vld [vmem:[%s2260_s5 + $0x2c8] sm:$0xff]  ;;  %v1222_v42 = vadd.f32 %v1221_v30, %v257_v33  ;;  %v261_v43 = vld [vmem:[%s2260_s5 + $0x2d0] sm:$0xff]  ;;  %v262_v44 = vld [vmem:[%s2260_s5 + $0x2d8] sm:$0xff]  ;;  %v1351_v46 = vadd.f32 %v1350_v34, %v258_v37  ;;  %v1480_v47 = vadd.f32 %v1479_v35, %v259_v38 }
  0x5a   : > { %v263_v45 = vld [vmem:[%s2260_s5 + $0x2e0] sm:$0xff]  ;;  %v1609_v48 = vadd.f32 %v1608_v36, %v260_v39  ;;  %v264_v49 = vld [vmem:[%s2260_s5 + $0x2e8] sm:$0xff]  ;;  %v265_v50 = vld [vmem:[%s2260_s5 + $0x2f0] sm:$0xff]  ;;  %v965_v52 = vadd.f32 %v964_v40, %v261_v43  ;;  %v1094_v53 = vadd.f32 %v1093_v41, %v262_v44 }
  0x5b   : > { %v266_v51 = vld [vmem:[%s2260_s5 + $0x2f8] sm:$0xff]  ;;  %v1223_v54 = vadd.f32 %v1222_v42, %v263_v45  ;;  %v267_v55 = vld [vmem:[%s2260_s5 + $0x300] sm:$0xff]  ;;  %v268_v56 = vld [vmem:[%s2260_s5 + $0x308] sm:$0xff]  ;;  %v1352_v58 = vadd.f32 %v1351_v46, %v264_v49  ;;  %v1481_v59 = vadd.f32 %v1480_v47, %v265_v50 }
  0x5c   : > { %v269_v57 = vld [vmem:[%s2260_s5 + $0x310] sm:$0xff]  ;;  %v1610_v60 = vadd.f32 %v1609_v48, %v266_v51  ;;  %v270_v61 = vld [vmem:[%s2260_s5 + $0x318] sm:$0xff]  ;;  %v271_v62 = vld [vmem:[%s2260_s5 + $0x320] sm:$0xff]  ;;  %v966_v0 = vadd.f32 %v965_v52, %v267_v55  ;;  %v1095_v1 = vadd.f32 %v1094_v53, %v268_v56 }
  0x5d   : > { %v272_v63 = vld [vmem:[%s2260_s5 + $0x328] sm:$0xff]  ;;  %v1224_v2 = vadd.f32 %v1223_v54, %v269_v57  ;;  %v273_v3 = vld [vmem:[%s2260_s5 + $0x330] sm:$0xff]  ;;  %v274_v4 = vld [vmem:[%s2260_s5 + $0x338] sm:$0xff]  ;;  %v1353_v6 = vadd.f32 %v1352_v58, %v270_v61  ;;  %v1482_v7 = vadd.f32 %v1481_v59, %v271_v62 }
  0x5e   : > { %v275_v5 = vld [vmem:[%s2260_s5 + $0x340] sm:$0xff]  ;;  %v1611_v8 = vadd.f32 %v1610_v60, %v272_v63  ;;  %v276_v9 = vld [vmem:[%s2260_s5 + $0x348] sm:$0xff]  ;;  %v277_v10 = vld [vmem:[%s2260_s5 + $0x350] sm:$0xff]  ;;  %v967_v12 = vadd.f32 %v966_v0, %v273_v3  ;;  %v1096_v13 = vadd.f32 %v1095_v1, %v274_v4 }
  0x5f   : > { %v278_v11 = vld [vmem:[%s2260_s5 + $0x358] sm:$0xff]  ;;  %v1225_v14 = vadd.f32 %v1224_v2, %v275_v5  ;;  %v279_v15 = vld [vmem:[%s2260_s5 + $0x360] sm:$0xff]  ;;  %v280_v16 = vld [vmem:[%s2260_s5 + $0x368] sm:$0xff]  ;;  %v1354_v18 = vadd.f32 %v1353_v6, %v276_v9  ;;  %v1483_v19 = vadd.f32 %v1482_v7, %v277_v10 }
  0x60   : > { %v281_v17 = vld [vmem:[%s2260_s5 + $0x370] sm:$0xff]  ;;  %v1612_v20 = vadd.f32 %v1611_v8, %v278_v11  ;;  %v282_v21 = vld [vmem:[%s2260_s5 + $0x378] sm:$0xff]  ;;  %v283_v22 = vld [vmem:[%s2260_s5 + $0x380] sm:$0xff]  ;;  %v968_v24 = vadd.f32 %v967_v12, %v279_v15  ;;  %v1097_v25 = vadd.f32 %v1096_v13, %v280_v16 }
  0x61   : > { %v284_v23 = vld [vmem:[%s2260_s5 + $0x388] sm:$0xff]  ;;  %v1226_v26 = vadd.f32 %v1225_v14, %v281_v17  ;;  %v285_v27 = vld [vmem:[%s2260_s5 + $0x390] sm:$0xff]  ;;  %v286_v28 = vld [vmem:[%s2260_s5 + $0x398] sm:$0xff]  ;;  %v1355_v30 = vadd.f32 %v1354_v18, %v282_v21  ;;  %v1484_v31 = vadd.f32 %v1483_v19, %v283_v22 }
  0x62   : > { %v287_v29 = vld [vmem:[%s2260_s5 + $0x3a0] sm:$0xff]  ;;  %v1613_v32 = vadd.f32 %v1612_v20, %v284_v23  ;;  %v288_v33 = vld [vmem:[%s2260_s5 + $0x3a8] sm:$0xff]  ;;  %v289_v34 = vld [vmem:[%s2260_s5 + $0x3b0] sm:$0xff]  ;;  %v969_v36 = vadd.f32 %v968_v24, %v285_v27  ;;  %v1098_v37 = vadd.f32 %v1097_v25, %v286_v28 }
  0x63   : > { %v290_v35 = vld [vmem:[%s2260_s5 + $0x3b8] sm:$0xff]  ;;  %v1227_v38 = vadd.f32 %v1226_v26, %v287_v29  ;;  %v291_v39 = vld [vmem:[%s2260_s5 + $0x3c0] sm:$0xff]  ;;  %v292_v40 = vld [vmem:[%s2260_s5 + $0x3c8] sm:$0xff]  ;;  %v1356_v42 = vadd.f32 %v1355_v30, %v288_v33  ;;  %v1485_v43 = vadd.f32 %v1484_v31, %v289_v34 }
  0x64   : > { %v293_v41 = vld [vmem:[%s2260_s5 + $0x3d0] sm:$0xff]  ;;  %v1614_v44 = vadd.f32 %v1613_v32, %v290_v35  ;;  %v294_v45 = vld [vmem:[%s2260_s5 + $0x3d8] sm:$0xff]  ;;  %v295_v46 = vld [vmem:[%s2260_s5 + $0x3e0] sm:$0xff]  ;;  %v970_v48 = vadd.f32 %v969_v36, %v291_v39  ;;  %v1099_v49 = vadd.f32 %v1098_v37, %v292_v40 }
  0x65   : > { %v296_v47 = vld [vmem:[%s2260_s5 + $0x3e8] sm:$0xff]  ;;  %v1228_v50 = vadd.f32 %v1227_v38, %v293_v41  ;;  %v297_v51 = vld [vmem:[%s2260_s5 + $0x3f0] sm:$0xff]  ;;  %v298_v52 = vld [vmem:[%s2260_s5 + $0x3f8] sm:$0xff]  ;;  %v1357_v54 = vadd.f32 %v1356_v42, %v294_v45  ;;  %v1486_v55 = vadd.f32 %v1485_v43, %v295_v46 }
  0x66   : > { %v299_v53 = vld [vmem:[%s2260_s5 + $0x400] sm:$0xff]  ;;  %v1615_v56 = vadd.f32 %v1614_v44, %v296_v47  ;;  %v300_v57 = vld [vmem:[%s2260_s5 + $0x408] sm:$0xff]  ;;  %v301_v58 = vld [vmem:[%s2260_s5 + $0x410] sm:$0xff]  ;;  %v971_v60 = vadd.f32 %v970_v48, %v297_v51  ;;  %v1100_v61 = vadd.f32 %v1099_v49, %v298_v52 }
  0x67   : > { %v302_v59 = vld [vmem:[%s2260_s5 + $0x418] sm:$0xff]  ;;  %v1229_v62 = vadd.f32 %v1228_v50, %v299_v53  ;;  %v303_v63 = vld [vmem:[%s2260_s5 + $0x420] sm:$0xff]  ;;  %v304_v0 = vld [vmem:[%s2260_s5 + $0x428] sm:$0xff]  ;;  %v1358_v2 = vadd.f32 %v1357_v54, %v300_v57  ;;  %v1487_v3 = vadd.f32 %v1486_v55, %v301_v58 }
  0x68   : > { %v305_v1 = vld [vmem:[%s2260_s5 + $0x430] sm:$0xff]  ;;  %v1616_v4 = vadd.f32 %v1615_v56, %v302_v59  ;;  %v306_v5 = vld [vmem:[%s2260_s5 + $0x438] sm:$0xff]  ;;  %v307_v6 = vld [vmem:[%s2260_s5 + $0x440] sm:$0xff]  ;;  %v972_v8 = vadd.f32 %v971_v60, %v303_v63  ;;  %v1101_v9 = vadd.f32 %v1100_v61, %v304_v0 }
  0x69   : > { %v308_v7 = vld [vmem:[%s2260_s5 + $0x448] sm:$0xff]  ;;  %v1230_v10 = vadd.f32 %v1229_v62, %v305_v1  ;;  %v309_v11 = vld [vmem:[%s2260_s5 + $0x450] sm:$0xff]  ;;  %v310_v12 = vld [vmem:[%s2260_s5 + $0x458] sm:$0xff]  ;;  %v1359_v14 = vadd.f32 %v1358_v2, %v306_v5  ;;  %v1488_v15 = vadd.f32 %v1487_v3, %v307_v6 }
  0x6a   : > { %v311_v13 = vld [vmem:[%s2260_s5 + $0x460] sm:$0xff]  ;;  %v1617_v16 = vadd.f32 %v1616_v4, %v308_v7  ;;  %v312_v17 = vld [vmem:[%s2260_s5 + $0x468] sm:$0xff]  ;;  %v313_v18 = vld [vmem:[%s2260_s5 + $0x470] sm:$0xff]  ;;  %v973_v20 = vadd.f32 %v972_v8, %v309_v11  ;;  %v1102_v21 = vadd.f32 %v1101_v9, %v310_v12 }
  0x6b   : > { %v314_v19 = vld [vmem:[%s2260_s5 + $0x478] sm:$0xff]  ;;  %v1231_v22 = vadd.f32 %v1230_v10, %v311_v13  ;;  %v315_v23 = vld [vmem:[%s2260_s5 + $0x480] sm:$0xff]  ;;  %v316_v24 = vld [vmem:[%s2260_s5 + $0x488] sm:$0xff]  ;;  %v1360_v26 = vadd.f32 %v1359_v14, %v312_v17  ;;  %v1489_v27 = vadd.f32 %v1488_v15, %v313_v18 }
  0x6c   : > { %v317_v25 = vld [vmem:[%s2260_s5 + $0x490] sm:$0xff]  ;;  %v1618_v28 = vadd.f32 %v1617_v16, %v314_v19  ;;  %v318_v29 = vld [vmem:[%s2260_s5 + $0x498] sm:$0xff]  ;;  %v319_v30 = vld [vmem:[%s2260_s5 + $0x4a0] sm:$0xff]  ;;  %v974_v32 = vadd.f32 %v973_v20, %v315_v23  ;;  %v1103_v33 = vadd.f32 %v1102_v21, %v316_v24 }
  0x6d   : > { %v320_v31 = vld [vmem:[%s2260_s5 + $0x4a8] sm:$0xff]  ;;  %v1232_v34 = vadd.f32 %v1231_v22, %v317_v25  ;;  %v321_v35 = vld [vmem:[%s2260_s5 + $0x4b0] sm:$0xff]  ;;  %v322_v36 = vld [vmem:[%s2260_s5 + $0x4b8] sm:$0xff]  ;;  %v1361_v38 = vadd.f32 %v1360_v26, %v318_v29  ;;  %v1490_v39 = vadd.f32 %v1489_v27, %v319_v30 }
  0x6e   : > { %v323_v37 = vld [vmem:[%s2260_s5 + $0x4c0] sm:$0xff]  ;;  %v1619_v40 = vadd.f32 %v1618_v28, %v320_v31  ;;  %v324_v41 = vld [vmem:[%s2260_s5 + $0x4c8] sm:$0xff]  ;;  %v325_v42 = vld [vmem:[%s2260_s5 + $0x4d0] sm:$0xff]  ;;  %v975_v44 = vadd.f32 %v974_v32, %v321_v35  ;;  %v1104_v45 = vadd.f32 %v1103_v33, %v322_v36 }
  0x6f   : > { %v326_v43 = vld [vmem:[%s2260_s5 + $0x4d8] sm:$0xff]  ;;  %v1233_v46 = vadd.f32 %v1232_v34, %v323_v37  ;;  %v327_v47 = vld [vmem:[%s2260_s5 + $0x4e0] sm:$0xff]  ;;  %v328_v48 = vld [vmem:[%s2260_s5 + $0x4e8] sm:$0xff]  ;;  %v1362_v50 = vadd.f32 %v1361_v38, %v324_v41  ;;  %v1491_v51 = vadd.f32 %v1490_v39, %v325_v42 }
  0x70   : > { %v329_v49 = vld [vmem:[%s2260_s5 + $0x4f0] sm:$0xff]  ;;  %v1620_v52 = vadd.f32 %v1619_v40, %v326_v43  ;;  %v330_v53 = vld [vmem:[%s2260_s5 + $0x4f8] sm:$0xff]  ;;  %v331_v54 = vld [vmem:[%s2260_s5 + $0x500] sm:$0xff]  ;;  %v976_v56 = vadd.f32 %v975_v44, %v327_v47  ;;  %v1105_v57 = vadd.f32 %v1104_v45, %v328_v48 }
  0x71   : > { %v332_v55 = vld [vmem:[%s2260_s5 + $0x508] sm:$0xff]  ;;  %v1234_v58 = vadd.f32 %v1233_v46, %v329_v49  ;;  %v333_v59 = vld [vmem:[%s2260_s5 + $0x510] sm:$0xff]  ;;  %v334_v60 = vld [vmem:[%s2260_s5 + $0x518] sm:$0xff]  ;;  %v1363_v62 = vadd.f32 %v1362_v50, %v330_v53  ;;  %v1492_v63 = vadd.f32 %v1491_v51, %v331_v54 }
  0x72   : > { %v335_v61 = vld [vmem:[%s2260_s5 + $0x520] sm:$0xff]  ;;  %v1621_v0 = vadd.f32 %v1620_v52, %v332_v55  ;;  %v336_v1 = vld [vmem:[%s2260_s5 + $0x528] sm:$0xff]  ;;  %v337_v2 = vld [vmem:[%s2260_s5 + $0x530] sm:$0xff]  ;;  %v977_v4 = vadd.f32 %v976_v56, %v333_v59  ;;  %v1106_v5 = vadd.f32 %v1105_v57, %v334_v60 }
  0x73   : > { %v338_v3 = vld [vmem:[%s2260_s5 + $0x538] sm:$0xff]  ;;  %v1235_v6 = vadd.f32 %v1234_v58, %v335_v61  ;;  %v339_v7 = vld [vmem:[%s2260_s5 + $0x540] sm:$0xff]  ;;  %v340_v8 = vld [vmem:[%s2260_s5 + $0x548] sm:$0xff]  ;;  %v1364_v10 = vadd.f32 %v1363_v62, %v336_v1  ;;  %v1493_v11 = vadd.f32 %v1492_v63, %v337_v2 }
  0x74   : > { %v341_v9 = vld [vmem:[%s2260_s5 + $0x550] sm:$0xff]  ;;  %v1622_v12 = vadd.f32 %v1621_v0, %v338_v3  ;;  %v342_v13 = vld [vmem:[%s2260_s5 + $0x558] sm:$0xff]  ;;  %v343_v14 = vld [vmem:[%s2260_s5 + $0x560] sm:$0xff]  ;;  %v978_v16 = vadd.f32 %v977_v4, %v339_v7  ;;  %v1107_v17 = vadd.f32 %v1106_v5, %v340_v8 }
  0x75   : > { %v344_v15 = vld [vmem:[%s2260_s5 + $0x568] sm:$0xff]  ;;  %v1236_v18 = vadd.f32 %v1235_v6, %v341_v9  ;;  %v345_v19 = vld [vmem:[%s2260_s5 + $0x570] sm:$0xff]  ;;  %v346_v20 = vld [vmem:[%s2260_s5 + $0x578] sm:$0xff]  ;;  %v1365_v22 = vadd.f32 %v1364_v10, %v342_v13  ;;  %v1494_v23 = vadd.f32 %v1493_v11, %v343_v14 }
  0x76   : > { %v347_v21 = vld [vmem:[%s2260_s5 + $0x580] sm:$0xff]  ;;  %v1623_v24 = vadd.f32 %v1622_v12, %v344_v15  ;;  %v348_v25 = vld [vmem:[%s2260_s5 + $0x588] sm:$0xff]  ;;  %v349_v26 = vld [vmem:[%s2260_s5 + $0x590] sm:$0xff]  ;;  %v979_v28 = vadd.f32 %v978_v16, %v345_v19  ;;  %v1108_v29 = vadd.f32 %v1107_v17, %v346_v20 }
  0x77   : > { %v350_v27 = vld [vmem:[%s2260_s5 + $0x598] sm:$0xff]  ;;  %v1237_v30 = vadd.f32 %v1236_v18, %v347_v21  ;;  %v351_v31 = vld [vmem:[%s2260_s5 + $0x5a0] sm:$0xff]  ;;  %v352_v32 = vld [vmem:[%s2260_s5 + $0x5a8] sm:$0xff]  ;;  %v1366_v34 = vadd.f32 %v1365_v22, %v348_v25  ;;  %v1495_v35 = vadd.f32 %v1494_v23, %v349_v26 }
  0x78   : > { %v353_v33 = vld [vmem:[%s2260_s5 + $0x5b0] sm:$0xff]  ;;  %v1624_v36 = vadd.f32 %v1623_v24, %v350_v27  ;;  %v354_v37 = vld [vmem:[%s2260_s5 + $0x5b8] sm:$0xff]  ;;  %v355_v38 = vld [vmem:[%s2260_s5 + $0x5c0] sm:$0xff]  ;;  %v980_v40 = vadd.f32 %v979_v28, %v351_v31  ;;  %v1109_v41 = vadd.f32 %v1108_v29, %v352_v32 }
  0x79   : > { %v356_v39 = vld [vmem:[%s2260_s5 + $0x5c8] sm:$0xff]  ;;  %v1238_v42 = vadd.f32 %v1237_v30, %v353_v33  ;;  %v357_v43 = vld [vmem:[%s2260_s5 + $0x5d0] sm:$0xff]  ;;  %v358_v44 = vld [vmem:[%s2260_s5 + $0x5d8] sm:$0xff]  ;;  %v1367_v46 = vadd.f32 %v1366_v34, %v354_v37  ;;  %v1496_v47 = vadd.f32 %v1495_v35, %v355_v38 }
  0x7a   : > { %v359_v45 = vld [vmem:[%s2260_s5 + $0x5e0] sm:$0xff]  ;;  %v1625_v48 = vadd.f32 %v1624_v36, %v356_v39  ;;  %v360_v49 = vld [vmem:[%s2260_s5 + $0x5e8] sm:$0xff]  ;;  %v361_v50 = vld [vmem:[%s2260_s5 + $0x5f0] sm:$0xff]  ;;  %v981_v52 = vadd.f32 %v980_v40, %v357_v43  ;;  %v1110_v53 = vadd.f32 %v1109_v41, %v358_v44 }
  0x7b   : > { %v362_v51 = vld [vmem:[%s2260_s5 + $0x5f8] sm:$0xff]  ;;  %v1239_v54 = vadd.f32 %v1238_v42, %v359_v45  ;;  %v363_v55 = vld [vmem:[%s2260_s5 + $0x600] sm:$0xff]  ;;  %v364_v56 = vld [vmem:[%s2260_s5 + $0x608] sm:$0xff]  ;;  %v1368_v58 = vadd.f32 %v1367_v46, %v360_v49  ;;  %v1497_v59 = vadd.f32 %v1496_v47, %v361_v50 }
  0x7c   : > { %v365_v57 = vld [vmem:[%s2260_s5 + $0x610] sm:$0xff]  ;;  %v1626_v60 = vadd.f32 %v1625_v48, %v362_v51  ;;  %v366_v61 = vld [vmem:[%s2260_s5 + $0x618] sm:$0xff]  ;;  %v367_v62 = vld [vmem:[%s2260_s5 + $0x620] sm:$0xff]  ;;  %v982_v0 = vadd.f32 %v981_v52, %v363_v55  ;;  %v1111_v1 = vadd.f32 %v1110_v53, %v364_v56 }
  0x7d   : > { %v368_v63 = vld [vmem:[%s2260_s5 + $0x628] sm:$0xff]  ;;  %v1240_v2 = vadd.f32 %v1239_v54, %v365_v57  ;;  %v369_v3 = vld [vmem:[%s2260_s5 + $0x630] sm:$0xff]  ;;  %v370_v4 = vld [vmem:[%s2260_s5 + $0x638] sm:$0xff]  ;;  %v1369_v6 = vadd.f32 %v1368_v58, %v366_v61  ;;  %v1498_v7 = vadd.f32 %v1497_v59, %v367_v62 }
  0x7e   : > { %v371_v5 = vld [vmem:[%s2260_s5 + $0x640] sm:$0xff]  ;;  %v1627_v8 = vadd.f32 %v1626_v60, %v368_v63  ;;  %v372_v9 = vld [vmem:[%s2260_s5 + $0x648] sm:$0xff]  ;;  %v373_v10 = vld [vmem:[%s2260_s5 + $0x650] sm:$0xff]  ;;  %v983_v12 = vadd.f32 %v982_v0, %v369_v3  ;;  %v1112_v13 = vadd.f32 %v1111_v1, %v370_v4 }
  0x7f   : > { %v374_v11 = vld [vmem:[%s2260_s5 + $0x658] sm:$0xff]  ;;  %v1241_v14 = vadd.f32 %v1240_v2, %v371_v5  ;;  %v375_v15 = vld [vmem:[%s2260_s5 + $0x660] sm:$0xff]  ;;  %v376_v16 = vld [vmem:[%s2260_s5 + $0x668] sm:$0xff]  ;;  %v1370_v18 = vadd.f32 %v1369_v6, %v372_v9  ;;  %v1499_v19 = vadd.f32 %v1498_v7, %v373_v10 }
  0x80   : > { %v377_v17 = vld [vmem:[%s2260_s5 + $0x670] sm:$0xff]  ;;  %v1628_v20 = vadd.f32 %v1627_v8, %v374_v11  ;;  %v378_v21 = vld [vmem:[%s2260_s5 + $0x678] sm:$0xff]  ;;  %v379_v22 = vld [vmem:[%s2260_s5 + $0x680] sm:$0xff]  ;;  %v984_v24 = vadd.f32 %v983_v12, %v375_v15  ;;  %v1113_v25 = vadd.f32 %v1112_v13, %v376_v16 }
  0x81   : > { %v380_v23 = vld [vmem:[%s2260_s5 + $0x688] sm:$0xff]  ;;  %v1242_v26 = vadd.f32 %v1241_v14, %v377_v17  ;;  %v381_v27 = vld [vmem:[%s2260_s5 + $0x690] sm:$0xff]  ;;  %v382_v28 = vld [vmem:[%s2260_s5 + $0x698] sm:$0xff]  ;;  %v1371_v30 = vadd.f32 %v1370_v18, %v378_v21  ;;  %v1500_v31 = vadd.f32 %v1499_v19, %v379_v22 }
  0x82   : > { %v383_v29 = vld [vmem:[%s2260_s5 + $0x6a0] sm:$0xff]  ;;  %v1629_v32 = vadd.f32 %v1628_v20, %v380_v23  ;;  %v384_v33 = vld [vmem:[%s2260_s5 + $0x6a8] sm:$0xff]  ;;  %v385_v34 = vld [vmem:[%s2260_s5 + $0x6b0] sm:$0xff]  ;;  %v985_v36 = vadd.f32 %v984_v24, %v381_v27  ;;  %v1114_v37 = vadd.f32 %v1113_v25, %v382_v28 }
  0x83   : > { %v386_v35 = vld [vmem:[%s2260_s5 + $0x6b8] sm:$0xff]  ;;  %v1243_v38 = vadd.f32 %v1242_v26, %v383_v29  ;;  %v387_v39 = vld [vmem:[%s2260_s5 + $0x6c0] sm:$0xff]  ;;  %v388_v40 = vld [vmem:[%s2260_s5 + $0x6c8] sm:$0xff]  ;;  %v1372_v42 = vadd.f32 %v1371_v30, %v384_v33  ;;  %v1501_v43 = vadd.f32 %v1500_v31, %v385_v34 }
  0x84   : > { %v389_v41 = vld [vmem:[%s2260_s5 + $0x6d0] sm:$0xff]  ;;  %v1630_v44 = vadd.f32 %v1629_v32, %v386_v35  ;;  %v390_v45 = vld [vmem:[%s2260_s5 + $0x6d8] sm:$0xff]  ;;  %v391_v46 = vld [vmem:[%s2260_s5 + $0x6e0] sm:$0xff]  ;;  %v986_v48 = vadd.f32 %v985_v36, %v387_v39  ;;  %v1115_v49 = vadd.f32 %v1114_v37, %v388_v40 }
  0x85   : > { %v392_v47 = vld [vmem:[%s2260_s5 + $0x6e8] sm:$0xff]  ;;  %v1244_v50 = vadd.f32 %v1243_v38, %v389_v41  ;;  %v393_v51 = vld [vmem:[%s2260_s5 + $0x6f0] sm:$0xff]  ;;  %v394_v52 = vld [vmem:[%s2260_s5 + $0x6f8] sm:$0xff]  ;;  %v1373_v54 = vadd.f32 %v1372_v42, %v390_v45  ;;  %v1502_v55 = vadd.f32 %v1501_v43, %v391_v46 }
  0x86   : > { %v395_v53 = vld [vmem:[%s2260_s5 + $0x700] sm:$0xff]  ;;  %v1631_v56 = vadd.f32 %v1630_v44, %v392_v47  ;;  %v396_v57 = vld [vmem:[%s2260_s5 + $0x708] sm:$0xff]  ;;  %v397_v58 = vld [vmem:[%s2260_s5 + $0x710] sm:$0xff]  ;;  %v987_v60 = vadd.f32 %v986_v48, %v393_v51  ;;  %v1116_v61 = vadd.f32 %v1115_v49, %v394_v52 }
  0x87   : > { %v398_v59 = vld [vmem:[%s2260_s5 + $0x718] sm:$0xff]  ;;  %v1245_v62 = vadd.f32 %v1244_v50, %v395_v53  ;;  %v399_v63 = vld [vmem:[%s2260_s5 + $0x720] sm:$0xff]  ;;  %v400_v0 = vld [vmem:[%s2260_s5 + $0x728] sm:$0xff]  ;;  %v1374_v2 = vadd.f32 %v1373_v54, %v396_v57  ;;  %v1503_v3 = vadd.f32 %v1502_v55, %v397_v58 }
  0x88   : > { %v401_v1 = vld [vmem:[%s2260_s5 + $0x730] sm:$0xff]  ;;  %v1632_v4 = vadd.f32 %v1631_v56, %v398_v59  ;;  %v402_v5 = vld [vmem:[%s2260_s5 + $0x738] sm:$0xff]  ;;  %v403_v6 = vld [vmem:[%s2260_s5 + $0x740] sm:$0xff]  ;;  %v988_v8 = vadd.f32 %v987_v60, %v399_v63  ;;  %v1117_v9 = vadd.f32 %v1116_v61, %v400_v0 }
  0x89   : > { %v404_v7 = vld [vmem:[%s2260_s5 + $0x748] sm:$0xff]  ;;  %v1246_v10 = vadd.f32 %v1245_v62, %v401_v1  ;;  %v405_v11 = vld [vmem:[%s2260_s5 + $0x750] sm:$0xff]  ;;  %v406_v12 = vld [vmem:[%s2260_s5 + $0x758] sm:$0xff]  ;;  %v1375_v14 = vadd.f32 %v1374_v2, %v402_v5  ;;  %v1504_v15 = vadd.f32 %v1503_v3, %v403_v6 }
  0x8a   : > { %v407_v13 = vld [vmem:[%s2260_s5 + $0x760] sm:$0xff]  ;;  %v1633_v16 = vadd.f32 %v1632_v4, %v404_v7  ;;  %v408_v17 = vld [vmem:[%s2260_s5 + $0x768] sm:$0xff]  ;;  %v409_v18 = vld [vmem:[%s2260_s5 + $0x770] sm:$0xff]  ;;  %v989_v20 = vadd.f32 %v988_v8, %v405_v11  ;;  %v1118_v21 = vadd.f32 %v1117_v9, %v406_v12 }
  0x8b   : > { %v410_v19 = vld [vmem:[%s2260_s5 + $0x778] sm:$0xff]  ;;  %v1247_v22 = vadd.f32 %v1246_v10, %v407_v13  ;;  %v411_v23 = vld [vmem:[%s2260_s5 + $0x780] sm:$0xff]  ;;  %v412_v24 = vld [vmem:[%s2260_s5 + $0x788] sm:$0xff]  ;;  %v1376_v26 = vadd.f32 %v1375_v14, %v408_v17  ;;  %v1505_v27 = vadd.f32 %v1504_v15, %v409_v18 }
  0x8c   : > { %v413_v25 = vld [vmem:[%s2260_s5 + $0x790] sm:$0xff]  ;;  %v1634_v28 = vadd.f32 %v1633_v16, %v410_v19  ;;  %v414_v29 = vld [vmem:[%s2260_s5 + $0x798] sm:$0xff]  ;;  %v415_v30 = vld [vmem:[%s2260_s5 + $0x7a0] sm:$0xff]  ;;  %v990_v32 = vadd.f32 %v989_v20, %v411_v23  ;;  %v1119_v33 = vadd.f32 %v1118_v21, %v412_v24 }
  0x8d   : > { %v416_v31 = vld [vmem:[%s2260_s5 + $0x7a8] sm:$0xff]  ;;  %v1248_v34 = vadd.f32 %v1247_v22, %v413_v25  ;;  %v417_v35 = vld [vmem:[%s2260_s5 + $0x7b0] sm:$0xff]  ;;  %v418_v36 = vld [vmem:[%s2260_s5 + $0x7b8] sm:$0xff]  ;;  %v1377_v38 = vadd.f32 %v1376_v26, %v414_v29  ;;  %v1506_v39 = vadd.f32 %v1505_v27, %v415_v30 }
  0x8e   : > { %v419_v37 = vld [vmem:[%s2260_s5 + $0x7c0] sm:$0xff]  ;;  %v1635_v40 = vadd.f32 %v1634_v28, %v416_v31  ;;  %v420_v41 = vld [vmem:[%s2260_s5 + $0x7c8] sm:$0xff]  ;;  %v421_v42 = vld [vmem:[%s2260_s5 + $0x7d0] sm:$0xff]  ;;  %v991_v44 = vadd.f32 %v990_v32, %v417_v35  ;;  %v1120_v45 = vadd.f32 %v1119_v33, %v418_v36 }
  0x8f   : > { %v422_v43 = vld [vmem:[%s2260_s5 + $0x7d8] sm:$0xff]  ;;  %v1249_v46 = vadd.f32 %v1248_v34, %v419_v37  ;;  %v423_v47 = vld [vmem:[%s2260_s5 + $0x7e0] sm:$0xff]  ;;  %v424_v48 = vld [vmem:[%s2260_s5 + $0x7e8] sm:$0xff]  ;;  %v1378_v50 = vadd.f32 %v1377_v38, %v420_v41  ;;  %v1507_v51 = vadd.f32 %v1506_v39, %v421_v42 }
  0x90   : > { %v425_v49 = vld [vmem:[%s2260_s5 + $0x7f0] sm:$0xff]  ;;  %v1636_v52 = vadd.f32 %v1635_v40, %v422_v43  ;;  %v426_v53 = vld [vmem:[%s2260_s5 + $0x7f8] sm:$0xff]  ;;  %v427_v54 = vld [vmem:[%s2260_s5 + $0x800] sm:$0xff]  ;;  %v992_v56 = vadd.f32 %v991_v44, %v423_v47  ;;  %v1121_v57 = vadd.f32 %v1120_v45, %v424_v48 }
  0x91   : > { %v428_v55 = vld [vmem:[%s2260_s5 + $0x808] sm:$0xff]  ;;  %v1250_v58 = vadd.f32 %v1249_v46, %v425_v49  ;;  %v429_v59 = vld [vmem:[%s2260_s5 + $0x810] sm:$0xff]  ;;  %v430_v60 = vld [vmem:[%s2260_s5 + $0x818] sm:$0xff]  ;;  %v1379_v62 = vadd.f32 %v1378_v50, %v426_v53  ;;  %v1508_v63 = vadd.f32 %v1507_v51, %v427_v54 }
  0x92   : > { %v431_v61 = vld [vmem:[%s2260_s5 + $0x820] sm:$0xff]  ;;  %v1637_v0 = vadd.f32 %v1636_v52, %v428_v55  ;;  %v432_v1 = vld [vmem:[%s2260_s5 + $0x828] sm:$0xff]  ;;  %v433_v2 = vld [vmem:[%s2260_s5 + $0x830] sm:$0xff]  ;;  %v993_v4 = vadd.f32 %v992_v56, %v429_v59  ;;  %v1122_v5 = vadd.f32 %v1121_v57, %v430_v60 }
  0x93   : > { %v434_v3 = vld [vmem:[%s2260_s5 + $0x838] sm:$0xff]  ;;  %v1251_v6 = vadd.f32 %v1250_v58, %v431_v61  ;;  %v435_v7 = vld [vmem:[%s2260_s5 + $0x840] sm:$0xff]  ;;  %v436_v8 = vld [vmem:[%s2260_s5 + $0x848] sm:$0xff]  ;;  %v1380_v10 = vadd.f32 %v1379_v62, %v432_v1  ;;  %v1509_v11 = vadd.f32 %v1508_v63, %v433_v2 }
  0x94   : > { %v437_v9 = vld [vmem:[%s2260_s5 + $0x850] sm:$0xff]  ;;  %v1638_v12 = vadd.f32 %v1637_v0, %v434_v3  ;;  %v438_v13 = vld [vmem:[%s2260_s5 + $0x858] sm:$0xff]  ;;  %v439_v14 = vld [vmem:[%s2260_s5 + $0x860] sm:$0xff]  ;;  %v994_v16 = vadd.f32 %v993_v4, %v435_v7  ;;  %v1123_v17 = vadd.f32 %v1122_v5, %v436_v8 }
  0x95   : > { %v440_v15 = vld [vmem:[%s2260_s5 + $0x868] sm:$0xff]  ;;  %v1252_v18 = vadd.f32 %v1251_v6, %v437_v9  ;;  %v441_v19 = vld [vmem:[%s2260_s5 + $0x870] sm:$0xff]  ;;  %v442_v20 = vld [vmem:[%s2260_s5 + $0x878] sm:$0xff]  ;;  %v1381_v22 = vadd.f32 %v1380_v10, %v438_v13  ;;  %v1510_v23 = vadd.f32 %v1509_v11, %v439_v14 }
  0x96   : > { %v443_v21 = vld [vmem:[%s2260_s5 + $0x880] sm:$0xff]  ;;  %v1639_v24 = vadd.f32 %v1638_v12, %v440_v15  ;;  %v444_v25 = vld [vmem:[%s2260_s5 + $0x888] sm:$0xff]  ;;  %v445_v26 = vld [vmem:[%s2260_s5 + $0x890] sm:$0xff]  ;;  %v995_v28 = vadd.f32 %v994_v16, %v441_v19  ;;  %v1124_v29 = vadd.f32 %v1123_v17, %v442_v20 }
  0x97   : > { %v446_v27 = vld [vmem:[%s2260_s5 + $0x898] sm:$0xff]  ;;  %v1253_v30 = vadd.f32 %v1252_v18, %v443_v21  ;;  %v447_v31 = vld [vmem:[%s2260_s5 + $0x8a0] sm:$0xff]  ;;  %v448_v32 = vld [vmem:[%s2260_s5 + $0x8a8] sm:$0xff]  ;;  %v1382_v34 = vadd.f32 %v1381_v22, %v444_v25  ;;  %v1511_v35 = vadd.f32 %v1510_v23, %v445_v26 }
  0x98   : > { %v449_v33 = vld [vmem:[%s2260_s5 + $0x8b0] sm:$0xff]  ;;  %v1640_v36 = vadd.f32 %v1639_v24, %v446_v27  ;;  %v450_v37 = vld [vmem:[%s2260_s5 + $0x8b8] sm:$0xff]  ;;  %v451_v38 = vld [vmem:[%s2260_s5 + $0x8c0] sm:$0xff]  ;;  %v996_v40 = vadd.f32 %v995_v28, %v447_v31  ;;  %v1125_v41 = vadd.f32 %v1124_v29, %v448_v32 }
  0x99   : > { %v452_v39 = vld [vmem:[%s2260_s5 + $0x8c8] sm:$0xff]  ;;  %v1254_v42 = vadd.f32 %v1253_v30, %v449_v33  ;;  %v453_v43 = vld [vmem:[%s2260_s5 + $0x8d0] sm:$0xff]  ;;  %v454_v44 = vld [vmem:[%s2260_s5 + $0x8d8] sm:$0xff]  ;;  %v1383_v46 = vadd.f32 %v1382_v34, %v450_v37  ;;  %v1512_v47 = vadd.f32 %v1511_v35, %v451_v38 }
  0x9a   : > { %v455_v45 = vld [vmem:[%s2260_s5 + $0x8e0] sm:$0xff]  ;;  %v1641_v48 = vadd.f32 %v1640_v36, %v452_v39  ;;  %v456_v49 = vld [vmem:[%s2260_s5 + $0x8e8] sm:$0xff]  ;;  %v457_v50 = vld [vmem:[%s2260_s5 + $0x8f0] sm:$0xff]  ;;  %v997_v52 = vadd.f32 %v996_v40, %v453_v43  ;;  %v1126_v53 = vadd.f32 %v1125_v41, %v454_v44 }
  0x9b   : > { %v458_v51 = vld [vmem:[%s2260_s5 + $0x8f8] sm:$0xff]  ;;  %v1255_v54 = vadd.f32 %v1254_v42, %v455_v45  ;;  %v459_v55 = vld [vmem:[%s2260_s5 + $0x900] sm:$0xff]  ;;  %v460_v56 = vld [vmem:[%s2260_s5 + $0x908] sm:$0xff]  ;;  %v1384_v58 = vadd.f32 %v1383_v46, %v456_v49  ;;  %v1513_v59 = vadd.f32 %v1512_v47, %v457_v50 }
  0x9c   : > { %v461_v57 = vld [vmem:[%s2260_s5 + $0x910] sm:$0xff]  ;;  %v1642_v60 = vadd.f32 %v1641_v48, %v458_v51  ;;  %v462_v61 = vld [vmem:[%s2260_s5 + $0x918] sm:$0xff]  ;;  %v463_v62 = vld [vmem:[%s2260_s5 + $0x920] sm:$0xff]  ;;  %v998_v0 = vadd.f32 %v997_v52, %v459_v55  ;;  %v1127_v1 = vadd.f32 %v1126_v53, %v460_v56 }
  0x9d   : > { %v464_v63 = vld [vmem:[%s2260_s5 + $0x928] sm:$0xff]  ;;  %v1256_v2 = vadd.f32 %v1255_v54, %v461_v57  ;;  %v465_v3 = vld [vmem:[%s2260_s5 + $0x930] sm:$0xff]  ;;  %v466_v4 = vld [vmem:[%s2260_s5 + $0x938] sm:$0xff]  ;;  %v1385_v6 = vadd.f32 %v1384_v58, %v462_v61  ;;  %v1514_v7 = vadd.f32 %v1513_v59, %v463_v62 }
  0x9e   : > { %v467_v5 = vld [vmem:[%s2260_s5 + $0x940] sm:$0xff]  ;;  %v1643_v8 = vadd.f32 %v1642_v60, %v464_v63  ;;  %v468_v9 = vld [vmem:[%s2260_s5 + $0x948] sm:$0xff]  ;;  %v469_v10 = vld [vmem:[%s2260_s5 + $0x950] sm:$0xff]  ;;  %v999_v12 = vadd.f32 %v998_v0, %v465_v3  ;;  %v1128_v13 = vadd.f32 %v1127_v1, %v466_v4 }
  0x9f   : > { %v470_v11 = vld [vmem:[%s2260_s5 + $0x958] sm:$0xff]  ;;  %v1257_v14 = vadd.f32 %v1256_v2, %v467_v5  ;;  %v471_v15 = vld [vmem:[%s2260_s5 + $0x960] sm:$0xff]  ;;  %v472_v16 = vld [vmem:[%s2260_s5 + $0x968] sm:$0xff]  ;;  %v1386_v18 = vadd.f32 %v1385_v6, %v468_v9  ;;  %v1515_v19 = vadd.f32 %v1514_v7, %v469_v10 }
  0xa0   : > { %v473_v17 = vld [vmem:[%s2260_s5 + $0x970] sm:$0xff]  ;;  %v1644_v20 = vadd.f32 %v1643_v8, %v470_v11  ;;  %v474_v21 = vld [vmem:[%s2260_s5 + $0x978] sm:$0xff]  ;;  %v475_v22 = vld [vmem:[%s2260_s5 + $0x980] sm:$0xff]  ;;  %v1000_v24 = vadd.f32 %v999_v12, %v471_v15  ;;  %v1129_v25 = vadd.f32 %v1128_v13, %v472_v16 }
  0xa1   : > { %v476_v23 = vld [vmem:[%s2260_s5 + $0x988] sm:$0xff]  ;;  %v1258_v26 = vadd.f32 %v1257_v14, %v473_v17  ;;  %v477_v27 = vld [vmem:[%s2260_s5 + $0x990] sm:$0xff]  ;;  %v478_v28 = vld [vmem:[%s2260_s5 + $0x998] sm:$0xff]  ;;  %v1387_v30 = vadd.f32 %v1386_v18, %v474_v21  ;;  %v1516_v31 = vadd.f32 %v1515_v19, %v475_v22 }
  0xa2   : > { %v479_v29 = vld [vmem:[%s2260_s5 + $0x9a0] sm:$0xff]  ;;  %v1645_v32 = vadd.f32 %v1644_v20, %v476_v23  ;;  %v480_v33 = vld [vmem:[%s2260_s5 + $0x9a8] sm:$0xff]  ;;  %v481_v34 = vld [vmem:[%s2260_s5 + $0x9b0] sm:$0xff]  ;;  %v1001_v36 = vadd.f32 %v1000_v24, %v477_v27  ;;  %v1130_v37 = vadd.f32 %v1129_v25, %v478_v28 }
  0xa3   : > { %v482_v35 = vld [vmem:[%s2260_s5 + $0x9b8] sm:$0xff]  ;;  %v1259_v38 = vadd.f32 %v1258_v26, %v479_v29  ;;  %v483_v39 = vld [vmem:[%s2260_s5 + $0x9c0] sm:$0xff]  ;;  %v484_v40 = vld [vmem:[%s2260_s5 + $0x9c8] sm:$0xff]  ;;  %v1388_v42 = vadd.f32 %v1387_v30, %v480_v33  ;;  %v1517_v43 = vadd.f32 %v1516_v31, %v481_v34 }
  0xa4   : > { %v485_v41 = vld [vmem:[%s2260_s5 + $0x9d0] sm:$0xff]  ;;  %v1646_v44 = vadd.f32 %v1645_v32, %v482_v35  ;;  %v486_v45 = vld [vmem:[%s2260_s5 + $0x9d8] sm:$0xff]  ;;  %v487_v46 = vld [vmem:[%s2260_s5 + $0x9e0] sm:$0xff]  ;;  %v1002_v48 = vadd.f32 %v1001_v36, %v483_v39  ;;  %v1131_v49 = vadd.f32 %v1130_v37, %v484_v40 }
  0xa5   : > { %v488_v47 = vld [vmem:[%s2260_s5 + $0x9e8] sm:$0xff]  ;;  %v1260_v50 = vadd.f32 %v1259_v38, %v485_v41  ;;  %v489_v51 = vld [vmem:[%s2260_s5 + $0x9f0] sm:$0xff]  ;;  %v490_v52 = vld [vmem:[%s2260_s5 + $0x9f8] sm:$0xff]  ;;  %v1389_v54 = vadd.f32 %v1388_v42, %v486_v45  ;;  %v1518_v55 = vadd.f32 %v1517_v43, %v487_v46 }
  0xa6   : > { %v491_v53 = vld [vmem:[%s2260_s5 + $0xa00] sm:$0xff]  ;;  %v1647_v56 = vadd.f32 %v1646_v44, %v488_v47  ;;  %v492_v57 = vld [vmem:[%s2260_s5 + $0xa08] sm:$0xff]  ;;  %v493_v58 = vld [vmem:[%s2260_s5 + $0xa10] sm:$0xff]  ;;  %v1003_v60 = vadd.f32 %v1002_v48, %v489_v51  ;;  %v1132_v61 = vadd.f32 %v1131_v49, %v490_v52 }
  0xa7   : > { %v494_v59 = vld [vmem:[%s2260_s5 + $0xa18] sm:$0xff]  ;;  %v1261_v62 = vadd.f32 %v1260_v50, %v491_v53  ;;  %v495_v63 = vld [vmem:[%s2260_s5 + $0xa20] sm:$0xff]  ;;  %v496_v0 = vld [vmem:[%s2260_s5 + $0xa28] sm:$0xff]  ;;  %v1390_v2 = vadd.f32 %v1389_v54, %v492_v57  ;;  %v1519_v3 = vadd.f32 %v1518_v55, %v493_v58 }
  0xa8   : > { %v497_v1 = vld [vmem:[%s2260_s5 + $0xa30] sm:$0xff]  ;;  %v1648_v4 = vadd.f32 %v1647_v56, %v494_v59  ;;  %v498_v5 = vld [vmem:[%s2260_s5 + $0xa38] sm:$0xff]  ;;  %v499_v6 = vld [vmem:[%s2260_s5 + $0xa40] sm:$0xff]  ;;  %v1004_v8 = vadd.f32 %v1003_v60, %v495_v63  ;;  %v1133_v9 = vadd.f32 %v1132_v61, %v496_v0 }
  0xa9   : > { %v500_v7 = vld [vmem:[%s2260_s5 + $0xa48] sm:$0xff]  ;;  %v1262_v10 = vadd.f32 %v1261_v62, %v497_v1  ;;  %v501_v11 = vld [vmem:[%s2260_s5 + $0xa50] sm:$0xff]  ;;  %v502_v12 = vld [vmem:[%s2260_s5 + $0xa58] sm:$0xff]  ;;  %v1391_v14 = vadd.f32 %v1390_v2, %v498_v5  ;;  %v1520_v15 = vadd.f32 %v1519_v3, %v499_v6 }
  0xaa   : > { %v503_v13 = vld [vmem:[%s2260_s5 + $0xa60] sm:$0xff]  ;;  %v1649_v16 = vadd.f32 %v1648_v4, %v500_v7  ;;  %v504_v17 = vld [vmem:[%s2260_s5 + $0xa68] sm:$0xff]  ;;  %v505_v18 = vld [vmem:[%s2260_s5 + $0xa70] sm:$0xff]  ;;  %v1005_v20 = vadd.f32 %v1004_v8, %v501_v11  ;;  %v1134_v21 = vadd.f32 %v1133_v9, %v502_v12 }
  0xab   : > { %v506_v19 = vld [vmem:[%s2260_s5 + $0xa78] sm:$0xff]  ;;  %v1263_v22 = vadd.f32 %v1262_v10, %v503_v13  ;;  %v507_v23 = vld [vmem:[%s2260_s5 + $0xa80] sm:$0xff]  ;;  %v508_v24 = vld [vmem:[%s2260_s5 + $0xa88] sm:$0xff]  ;;  %v1392_v26 = vadd.f32 %v1391_v14, %v504_v17  ;;  %v1521_v27 = vadd.f32 %v1520_v15, %v505_v18 }
  0xac   : > { %v509_v25 = vld [vmem:[%s2260_s5 + $0xa90] sm:$0xff]  ;;  %v1650_v28 = vadd.f32 %v1649_v16, %v506_v19  ;;  %v510_v29 = vld [vmem:[%s2260_s5 + $0xa98] sm:$0xff]  ;;  %v511_v30 = vld [vmem:[%s2260_s5 + $0xaa0] sm:$0xff]  ;;  %v1006_v32 = vadd.f32 %v1005_v20, %v507_v23  ;;  %v1135_v33 = vadd.f32 %v1134_v21, %v508_v24 }
  0xad   : > { %v512_v31 = vld [vmem:[%s2260_s5 + $0xaa8] sm:$0xff]  ;;  %v1264_v34 = vadd.f32 %v1263_v22, %v509_v25  ;;  %v513_v35 = vld [vmem:[%s2260_s5 + $0xab0] sm:$0xff]  ;;  %v514_v36 = vld [vmem:[%s2260_s5 + $0xab8] sm:$0xff]  ;;  %v1393_v38 = vadd.f32 %v1392_v26, %v510_v29  ;;  %v1522_v39 = vadd.f32 %v1521_v27, %v511_v30 }
  0xae   : > { %v515_v37 = vld [vmem:[%s2260_s5 + $0xac0] sm:$0xff]  ;;  %v1651_v40 = vadd.f32 %v1650_v28, %v512_v31  ;;  %v516_v41 = vld [vmem:[%s2260_s5 + $0xac8] sm:$0xff]  ;;  %v517_v42 = vld [vmem:[%s2260_s5 + $0xad0] sm:$0xff]  ;;  %v1007_v44 = vadd.f32 %v1006_v32, %v513_v35  ;;  %v1136_v45 = vadd.f32 %v1135_v33, %v514_v36 }
  0xaf   : > { %v518_v43 = vld [vmem:[%s2260_s5 + $0xad8] sm:$0xff]  ;;  %v1265_v46 = vadd.f32 %v1264_v34, %v515_v37  ;;  %v519_v47 = vld [vmem:[%s2260_s5 + $0xae0] sm:$0xff]  ;;  %v520_v48 = vld [vmem:[%s2260_s5 + $0xae8] sm:$0xff]  ;;  %v1394_v50 = vadd.f32 %v1393_v38, %v516_v41  ;;  %v1523_v51 = vadd.f32 %v1522_v39, %v517_v42 }
  0xb0   : > { %v521_v49 = vld [vmem:[%s2260_s5 + $0xaf0] sm:$0xff]  ;;  %v1652_v52 = vadd.f32 %v1651_v40, %v518_v43  ;;  %v522_v53 = vld [vmem:[%s2260_s5 + $0xaf8] sm:$0xff]  ;;  %v523_v54 = vld [vmem:[%s2260_s5 + $0xb00] sm:$0xff]  ;;  %v1008_v56 = vadd.f32 %v1007_v44, %v519_v47  ;;  %v1137_v57 = vadd.f32 %v1136_v45, %v520_v48 }
  0xb1   : > { %v524_v55 = vld [vmem:[%s2260_s5 + $0xb08] sm:$0xff]  ;;  %v1266_v58 = vadd.f32 %v1265_v46, %v521_v49  ;;  %v525_v59 = vld [vmem:[%s2260_s5 + $0xb10] sm:$0xff]  ;;  %v526_v60 = vld [vmem:[%s2260_s5 + $0xb18] sm:$0xff]  ;;  %v1395_v62 = vadd.f32 %v1394_v50, %v522_v53  ;;  %v1524_v63 = vadd.f32 %v1523_v51, %v523_v54 }
  0xb2   : > { %v527_v61 = vld [vmem:[%s2260_s5 + $0xb20] sm:$0xff]  ;;  %v1653_v0 = vadd.f32 %v1652_v52, %v524_v55  ;;  %v528_v1 = vld [vmem:[%s2260_s5 + $0xb28] sm:$0xff]  ;;  %v529_v2 = vld [vmem:[%s2260_s5 + $0xb30] sm:$0xff]  ;;  %v1009_v4 = vadd.f32 %v1008_v56, %v525_v59  ;;  %v1138_v5 = vadd.f32 %v1137_v57, %v526_v60 }
  0xb3   : > { %v530_v3 = vld [vmem:[%s2260_s5 + $0xb38] sm:$0xff]  ;;  %v1267_v6 = vadd.f32 %v1266_v58, %v527_v61  ;;  %v531_v7 = vld [vmem:[%s2260_s5 + $0xb40] sm:$0xff]  ;;  %v532_v8 = vld [vmem:[%s2260_s5 + $0xb48] sm:$0xff]  ;;  %v1396_v10 = vadd.f32 %v1395_v62, %v528_v1  ;;  %v1525_v11 = vadd.f32 %v1524_v63, %v529_v2 }
  0xb4   : > { %v533_v9 = vld [vmem:[%s2260_s5 + $0xb50] sm:$0xff]  ;;  %v1654_v12 = vadd.f32 %v1653_v0, %v530_v3  ;;  %v534_v13 = vld [vmem:[%s2260_s5 + $0xb58] sm:$0xff]  ;;  %v535_v14 = vld [vmem:[%s2260_s5 + $0xb60] sm:$0xff]  ;;  %v1010_v16 = vadd.f32 %v1009_v4, %v531_v7  ;;  %v1139_v17 = vadd.f32 %v1138_v5, %v532_v8 }
  0xb5   : > { %v536_v15 = vld [vmem:[%s2260_s5 + $0xb68] sm:$0xff]  ;;  %v1268_v18 = vadd.f32 %v1267_v6, %v533_v9  ;;  %v537_v19 = vld [vmem:[%s2260_s5 + $0xb70] sm:$0xff]  ;;  %v538_v20 = vld [vmem:[%s2260_s5 + $0xb78] sm:$0xff]  ;;  %v1397_v22 = vadd.f32 %v1396_v10, %v534_v13  ;;  %v1526_v23 = vadd.f32 %v1525_v11, %v535_v14 }
  0xb6   : > { %v539_v21 = vld [vmem:[%s2260_s5 + $0xb80] sm:$0xff]  ;;  %v1655_v24 = vadd.f32 %v1654_v12, %v536_v15  ;;  %v540_v25 = vld [vmem:[%s2260_s5 + $0xb88] sm:$0xff]  ;;  %v541_v26 = vld [vmem:[%s2260_s5 + $0xb90] sm:$0xff]  ;;  %v1011_v28 = vadd.f32 %v1010_v16, %v537_v19  ;;  %v1140_v29 = vadd.f32 %v1139_v17, %v538_v20 }
  0xb7   : > { %v542_v27 = vld [vmem:[%s2260_s5 + $0xb98] sm:$0xff]  ;;  %v1269_v30 = vadd.f32 %v1268_v18, %v539_v21  ;;  %v543_v31 = vld [vmem:[%s2260_s5 + $0xba0] sm:$0xff]  ;;  %v544_v32 = vld [vmem:[%s2260_s5 + $0xba8] sm:$0xff]  ;;  %v1398_v34 = vadd.f32 %v1397_v22, %v540_v25  ;;  %v1527_v35 = vadd.f32 %v1526_v23, %v541_v26 }
  0xb8   : > { %v545_v33 = vld [vmem:[%s2260_s5 + $0xbb0] sm:$0xff]  ;;  %v1656_v36 = vadd.f32 %v1655_v24, %v542_v27  ;;  %v546_v37 = vld [vmem:[%s2260_s5 + $0xbb8] sm:$0xff]  ;;  %v547_v38 = vld [vmem:[%s2260_s5 + $0xbc0] sm:$0xff]  ;;  %v1012_v40 = vadd.f32 %v1011_v28, %v543_v31  ;;  %v1141_v41 = vadd.f32 %v1140_v29, %v544_v32 }
  0xb9   : > { %v548_v39 = vld [vmem:[%s2260_s5 + $0xbc8] sm:$0xff]  ;;  %v1270_v42 = vadd.f32 %v1269_v30, %v545_v33  ;;  %v549_v43 = vld [vmem:[%s2260_s5 + $0xbd0] sm:$0xff]  ;;  %v550_v44 = vld [vmem:[%s2260_s5 + $0xbd8] sm:$0xff]  ;;  %v1399_v46 = vadd.f32 %v1398_v34, %v546_v37  ;;  %v1528_v47 = vadd.f32 %v1527_v35, %v547_v38 }
  0xba   : > { %v551_v45 = vld [vmem:[%s2260_s5 + $0xbe0] sm:$0xff]  ;;  %v1657_v48 = vadd.f32 %v1656_v36, %v548_v39  ;;  %v552_v49 = vld [vmem:[%s2260_s5 + $0xbe8] sm:$0xff]  ;;  %v553_v50 = vld [vmem:[%s2260_s5 + $0xbf0] sm:$0xff]  ;;  %v1013_v52 = vadd.f32 %v1012_v40, %v549_v43  ;;  %v1142_v53 = vadd.f32 %v1141_v41, %v550_v44 }
  0xbb   : > { %v554_v51 = vld [vmem:[%s2260_s5 + $0xbf8] sm:$0xff]  ;;  %v1271_v54 = vadd.f32 %v1270_v42, %v551_v45  ;;  %v555_v55 = vld [vmem:[%s2260_s5 + $0xc00] sm:$0xff]  ;;  %v556_v56 = vld [vmem:[%s2260_s5 + $0xc08] sm:$0xff]  ;;  %v1400_v58 = vadd.f32 %v1399_v46, %v552_v49  ;;  %v1529_v59 = vadd.f32 %v1528_v47, %v553_v50 }
  0xbc   : > { %v557_v57 = vld [vmem:[%s2260_s5 + $0xc10] sm:$0xff]  ;;  %v1658_v60 = vadd.f32 %v1657_v48, %v554_v51  ;;  %v558_v61 = vld [vmem:[%s2260_s5 + $0xc18] sm:$0xff]  ;;  %v559_v62 = vld [vmem:[%s2260_s5 + $0xc20] sm:$0xff]  ;;  %v1014_v0 = vadd.f32 %v1013_v52, %v555_v55  ;;  %v1143_v1 = vadd.f32 %v1142_v53, %v556_v56 }
  0xbd   : > { %v560_v63 = vld [vmem:[%s2260_s5 + $0xc28] sm:$0xff]  ;;  %v1272_v2 = vadd.f32 %v1271_v54, %v557_v57  ;;  %v561_v3 = vld [vmem:[%s2260_s5 + $0xc30] sm:$0xff]  ;;  %v562_v4 = vld [vmem:[%s2260_s5 + $0xc38] sm:$0xff]  ;;  %v1401_v6 = vadd.f32 %v1400_v58, %v558_v61  ;;  %v1530_v7 = vadd.f32 %v1529_v59, %v559_v62 }
  0xbe   : > { %v563_v5 = vld [vmem:[%s2260_s5 + $0xc40] sm:$0xff]  ;;  %v1659_v8 = vadd.f32 %v1658_v60, %v560_v63  ;;  %v564_v9 = vld [vmem:[%s2260_s5 + $0xc48] sm:$0xff]  ;;  %v565_v10 = vld [vmem:[%s2260_s5 + $0xc50] sm:$0xff]  ;;  %v1015_v12 = vadd.f32 %v1014_v0, %v561_v3  ;;  %v1144_v13 = vadd.f32 %v1143_v1, %v562_v4 }
  0xbf   : > { %v566_v11 = vld [vmem:[%s2260_s5 + $0xc58] sm:$0xff]  ;;  %v1273_v14 = vadd.f32 %v1272_v2, %v563_v5  ;;  %v567_v15 = vld [vmem:[%s2260_s5 + $0xc60] sm:$0xff]  ;;  %v568_v16 = vld [vmem:[%s2260_s5 + $0xc68] sm:$0xff]  ;;  %v1402_v18 = vadd.f32 %v1401_v6, %v564_v9  ;;  %v1531_v19 = vadd.f32 %v1530_v7, %v565_v10 }
  0xc0   : > { %v569_v17 = vld [vmem:[%s2260_s5 + $0xc70] sm:$0xff]  ;;  %v1660_v20 = vadd.f32 %v1659_v8, %v566_v11  ;;  %v570_v21 = vld [vmem:[%s2260_s5 + $0xc78] sm:$0xff]  ;;  %v571_v22 = vld [vmem:[%s2260_s5 + $0xc80] sm:$0xff]  ;;  %v1016_v24 = vadd.f32 %v1015_v12, %v567_v15  ;;  %v1145_v25 = vadd.f32 %v1144_v13, %v568_v16 }
  0xc1   : > { %v572_v23 = vld [vmem:[%s2260_s5 + $0xc88] sm:$0xff]  ;;  %v1274_v26 = vadd.f32 %v1273_v14, %v569_v17  ;;  %v573_v27 = vld [vmem:[%s2260_s5 + $0xc90] sm:$0xff]  ;;  %v574_v28 = vld [vmem:[%s2260_s5 + $0xc98] sm:$0xff]  ;;  %v1403_v30 = vadd.f32 %v1402_v18, %v570_v21  ;;  %v1532_v31 = vadd.f32 %v1531_v19, %v571_v22 }
  0xc2   : > { %v575_v29 = vld [vmem:[%s2260_s5 + $0xca0] sm:$0xff]  ;;  %v1661_v32 = vadd.f32 %v1660_v20, %v572_v23  ;;  %v576_v33 = vld [vmem:[%s2260_s5 + $0xca8] sm:$0xff]  ;;  %v577_v34 = vld [vmem:[%s2260_s5 + $0xcb0] sm:$0xff]  ;;  %v1017_v36 = vadd.f32 %v1016_v24, %v573_v27  ;;  %v1146_v37 = vadd.f32 %v1145_v25, %v574_v28 }
  0xc3   : > { %v578_v35 = vld [vmem:[%s2260_s5 + $0xcb8] sm:$0xff]  ;;  %v1275_v38 = vadd.f32 %v1274_v26, %v575_v29  ;;  %v579_v39 = vld [vmem:[%s2260_s5 + $0xcc0] sm:$0xff]  ;;  %v580_v40 = vld [vmem:[%s2260_s5 + $0xcc8] sm:$0xff]  ;;  %v1404_v42 = vadd.f32 %v1403_v30, %v576_v33  ;;  %v1533_v43 = vadd.f32 %v1532_v31, %v577_v34 }
  0xc4   : > { %v581_v41 = vld [vmem:[%s2260_s5 + $0xcd0] sm:$0xff]  ;;  %v1662_v44 = vadd.f32 %v1661_v32, %v578_v35  ;;  %v582_v45 = vld [vmem:[%s2260_s5 + $0xcd8] sm:$0xff]  ;;  %v583_v46 = vld [vmem:[%s2260_s5 + $0xce0] sm:$0xff]  ;;  %v1018_v48 = vadd.f32 %v1017_v36, %v579_v39  ;;  %v1147_v49 = vadd.f32 %v1146_v37, %v580_v40 }
  0xc5   : > { %v584_v47 = vld [vmem:[%s2260_s5 + $0xce8] sm:$0xff]  ;;  %v1276_v50 = vadd.f32 %v1275_v38, %v581_v41  ;;  %v585_v51 = vld [vmem:[%s2260_s5 + $0xcf0] sm:$0xff]  ;;  %v586_v52 = vld [vmem:[%s2260_s5 + $0xcf8] sm:$0xff]  ;;  %v1405_v54 = vadd.f32 %v1404_v42, %v582_v45  ;;  %v1534_v55 = vadd.f32 %v1533_v43, %v583_v46 }
  0xc6   : > { %v587_v53 = vld [vmem:[%s2260_s5 + $0xd00] sm:$0xff]  ;;  %v1663_v56 = vadd.f32 %v1662_v44, %v584_v47  ;;  %v588_v57 = vld [vmem:[%s2260_s5 + $0xd08] sm:$0xff]  ;;  %v589_v58 = vld [vmem:[%s2260_s5 + $0xd10] sm:$0xff]  ;;  %v1019_v60 = vadd.f32 %v1018_v48, %v585_v51  ;;  %v1148_v61 = vadd.f32 %v1147_v49, %v586_v52 }
  0xc7   : > { %v590_v59 = vld [vmem:[%s2260_s5 + $0xd18] sm:$0xff]  ;;  %v1277_v62 = vadd.f32 %v1276_v50, %v587_v53  ;;  %v591_v63 = vld [vmem:[%s2260_s5 + $0xd20] sm:$0xff]  ;;  %v592_v0 = vld [vmem:[%s2260_s5 + $0xd28] sm:$0xff]  ;;  %v1406_v2 = vadd.f32 %v1405_v54, %v588_v57  ;;  %v1535_v3 = vadd.f32 %v1534_v55, %v589_v58 }
  0xc8   : > { %v593_v1 = vld [vmem:[%s2260_s5 + $0xd30] sm:$0xff]  ;;  %v1664_v4 = vadd.f32 %v1663_v56, %v590_v59  ;;  %v594_v5 = vld [vmem:[%s2260_s5 + $0xd38] sm:$0xff]  ;;  %v595_v6 = vld [vmem:[%s2260_s5 + $0xd40] sm:$0xff]  ;;  %v1020_v8 = vadd.f32 %v1019_v60, %v591_v63  ;;  %v1149_v9 = vadd.f32 %v1148_v61, %v592_v0 }
  0xc9   : > { %v596_v7 = vld [vmem:[%s2260_s5 + $0xd48] sm:$0xff]  ;;  %v1278_v10 = vadd.f32 %v1277_v62, %v593_v1  ;;  %v597_v11 = vld [vmem:[%s2260_s5 + $0xd50] sm:$0xff]  ;;  %v598_v12 = vld [vmem:[%s2260_s5 + $0xd58] sm:$0xff]  ;;  %v1407_v14 = vadd.f32 %v1406_v2, %v594_v5  ;;  %v1536_v15 = vadd.f32 %v1535_v3, %v595_v6 }
  0xca   : > { %v599_v13 = vld [vmem:[%s2260_s5 + $0xd60] sm:$0xff]  ;;  %v1665_v16 = vadd.f32 %v1664_v4, %v596_v7  ;;  %v600_v17 = vld [vmem:[%s2260_s5 + $0xd68] sm:$0xff]  ;;  %v601_v18 = vld [vmem:[%s2260_s5 + $0xd70] sm:$0xff]  ;;  %v1021_v20 = vadd.f32 %v1020_v8, %v597_v11  ;;  %v1150_v21 = vadd.f32 %v1149_v9, %v598_v12 }
  0xcb   : > { %v602_v19 = vld [vmem:[%s2260_s5 + $0xd78] sm:$0xff]  ;;  %v1279_v22 = vadd.f32 %v1278_v10, %v599_v13  ;;  %v603_v23 = vld [vmem:[%s2260_s5 + $0xd80] sm:$0xff]  ;;  %v604_v24 = vld [vmem:[%s2260_s5 + $0xd88] sm:$0xff]  ;;  %v1408_v26 = vadd.f32 %v1407_v14, %v600_v17  ;;  %v1537_v27 = vadd.f32 %v1536_v15, %v601_v18 }
  0xcc   : > { %v605_v25 = vld [vmem:[%s2260_s5 + $0xd90] sm:$0xff]  ;;  %v1666_v28 = vadd.f32 %v1665_v16, %v602_v19  ;;  %v606_v29 = vld [vmem:[%s2260_s5 + $0xd98] sm:$0xff]  ;;  %v607_v30 = vld [vmem:[%s2260_s5 + $0xda0] sm:$0xff]  ;;  %v1022_v32 = vadd.f32 %v1021_v20, %v603_v23  ;;  %v1151_v33 = vadd.f32 %v1150_v21, %v604_v24 }
  0xcd   : > { %v608_v31 = vld [vmem:[%s2260_s5 + $0xda8] sm:$0xff]  ;;  %v1280_v34 = vadd.f32 %v1279_v22, %v605_v25  ;;  %v609_v35 = vld [vmem:[%s2260_s5 + $0xdb0] sm:$0xff]  ;;  %v610_v36 = vld [vmem:[%s2260_s5 + $0xdb8] sm:$0xff]  ;;  %v1409_v38 = vadd.f32 %v1408_v26, %v606_v29  ;;  %v1538_v39 = vadd.f32 %v1537_v27, %v607_v30 }
  0xce   : > { %v611_v37 = vld [vmem:[%s2260_s5 + $0xdc0] sm:$0xff]  ;;  %v1667_v40 = vadd.f32 %v1666_v28, %v608_v31  ;;  %v612_v41 = vld [vmem:[%s2260_s5 + $0xdc8] sm:$0xff]  ;;  %v613_v42 = vld [vmem:[%s2260_s5 + $0xdd0] sm:$0xff]  ;;  %v1023_v44 = vadd.f32 %v1022_v32, %v609_v35  ;;  %v1152_v45 = vadd.f32 %v1151_v33, %v610_v36 }
  0xcf   : > { %v614_v43 = vld [vmem:[%s2260_s5 + $0xdd8] sm:$0xff]  ;;  %v1281_v46 = vadd.f32 %v1280_v34, %v611_v37  ;;  %v615_v47 = vld [vmem:[%s2260_s5 + $0xde0] sm:$0xff]  ;;  %v616_v48 = vld [vmem:[%s2260_s5 + $0xde8] sm:$0xff]  ;;  %v1410_v50 = vadd.f32 %v1409_v38, %v612_v41  ;;  %v1539_v51 = vadd.f32 %v1538_v39, %v613_v42 }
  0xd0   : > { %v617_v49 = vld [vmem:[%s2260_s5 + $0xdf0] sm:$0xff]  ;;  %v1668_v52 = vadd.f32 %v1667_v40, %v614_v43  ;;  %v618_v53 = vld [vmem:[%s2260_s5 + $0xdf8] sm:$0xff]  ;;  %v619_v54 = vld [vmem:[%s2260_s5 + $0xe00] sm:$0xff]  ;;  %v1024_v56 = vadd.f32 %v1023_v44, %v615_v47  ;;  %v1153_v57 = vadd.f32 %v1152_v45, %v616_v48 }
  0xd1   : > { %v620_v55 = vld [vmem:[%s2260_s5 + $0xe08] sm:$0xff]  ;;  %v1282_v58 = vadd.f32 %v1281_v46, %v617_v49  ;;  %v621_v59 = vld [vmem:[%s2260_s5 + $0xe10] sm:$0xff]  ;;  %v622_v60 = vld [vmem:[%s2260_s5 + $0xe18] sm:$0xff]  ;;  %v1411_v62 = vadd.f32 %v1410_v50, %v618_v53  ;;  %v1540_v63 = vadd.f32 %v1539_v51, %v619_v54 }
  0xd2   : > { %v623_v61 = vld [vmem:[%s2260_s5 + $0xe20] sm:$0xff]  ;;  %v1669_v0 = vadd.f32 %v1668_v52, %v620_v55  ;;  %v624_v1 = vld [vmem:[%s2260_s5 + $0xe28] sm:$0xff]  ;;  %v625_v2 = vld [vmem:[%s2260_s5 + $0xe30] sm:$0xff]  ;;  %v1025_v4 = vadd.f32 %v1024_v56, %v621_v59  ;;  %v1154_v5 = vadd.f32 %v1153_v57, %v622_v60 }
  0xd3   : > { %v626_v3 = vld [vmem:[%s2260_s5 + $0xe38] sm:$0xff]  ;;  %v1283_v6 = vadd.f32 %v1282_v58, %v623_v61  ;;  %v627_v7 = vld [vmem:[%s2260_s5 + $0xe40] sm:$0xff]  ;;  %v628_v8 = vld [vmem:[%s2260_s5 + $0xe48] sm:$0xff]  ;;  %v1412_v10 = vadd.f32 %v1411_v62, %v624_v1  ;;  %v1541_v11 = vadd.f32 %v1540_v63, %v625_v2 }
  0xd4   : > { %v629_v9 = vld [vmem:[%s2260_s5 + $0xe50] sm:$0xff]  ;;  %v1670_v12 = vadd.f32 %v1669_v0, %v626_v3  ;;  %v630_v13 = vld [vmem:[%s2260_s5 + $0xe58] sm:$0xff]  ;;  %v631_v14 = vld [vmem:[%s2260_s5 + $0xe60] sm:$0xff]  ;;  %v1026_v16 = vadd.f32 %v1025_v4, %v627_v7  ;;  %v1155_v17 = vadd.f32 %v1154_v5, %v628_v8 }
  0xd5   : > { %v632_v15 = vld [vmem:[%s2260_s5 + $0xe68] sm:$0xff]  ;;  %v1284_v18 = vadd.f32 %v1283_v6, %v629_v9  ;;  %v633_v19 = vld [vmem:[%s2260_s5 + $0xe70] sm:$0xff]  ;;  %v634_v20 = vld [vmem:[%s2260_s5 + $0xe78] sm:$0xff]  ;;  %v1413_v22 = vadd.f32 %v1412_v10, %v630_v13  ;;  %v1542_v23 = vadd.f32 %v1541_v11, %v631_v14 }
  0xd6   : > { %v635_v21 = vld [vmem:[%s2260_s5 + $0xe80] sm:$0xff]  ;;  %v1671_v24 = vadd.f32 %v1670_v12, %v632_v15  ;;  %v636_v25 = vld [vmem:[%s2260_s5 + $0xe88] sm:$0xff]  ;;  %v637_v26 = vld [vmem:[%s2260_s5 + $0xe90] sm:$0xff]  ;;  %v1027_v28 = vadd.f32 %v1026_v16, %v633_v19  ;;  %v1156_v29 = vadd.f32 %v1155_v17, %v634_v20 }
  0xd7   : > { %v638_v27 = vld [vmem:[%s2260_s5 + $0xe98] sm:$0xff]  ;;  %v1285_v30 = vadd.f32 %v1284_v18, %v635_v21  ;;  %v639_v31 = vld [vmem:[%s2260_s5 + $0xea0] sm:$0xff]  ;;  %v640_v32 = vld [vmem:[%s2260_s5 + $0xea8] sm:$0xff]  ;;  %v1414_v34 = vadd.f32 %v1413_v22, %v636_v25  ;;  %v1543_v35 = vadd.f32 %v1542_v23, %v637_v26 }
  0xd8   : > { %v641_v33 = vld [vmem:[%s2260_s5 + $0xeb0] sm:$0xff]  ;;  %v1672_v36 = vadd.f32 %v1671_v24, %v638_v27  ;;  %v642_v37 = vld [vmem:[%s2260_s5 + $0xeb8] sm:$0xff]  ;;  %v643_v38 = vld [vmem:[%s2260_s5 + $0xec0] sm:$0xff]  ;;  %v1028_v40 = vadd.f32 %v1027_v28, %v639_v31  ;;  %v1157_v41 = vadd.f32 %v1156_v29, %v640_v32 }
  0xd9   : > { %v644_v39 = vld [vmem:[%s2260_s5 + $0xec8] sm:$0xff]  ;;  %v1286_v42 = vadd.f32 %v1285_v30, %v641_v33  ;;  %v645_v43 = vld [vmem:[%s2260_s5 + $0xed0] sm:$0xff]  ;;  %v646_v44 = vld [vmem:[%s2260_s5 + $0xed8] sm:$0xff]  ;;  %v1415_v46 = vadd.f32 %v1414_v34, %v642_v37  ;;  %v1544_v47 = vadd.f32 %v1543_v35, %v643_v38 }
  0xda   : > { %v647_v45 = vld [vmem:[%s2260_s5 + $0xee0] sm:$0xff]  ;;  %v1673_v48 = vadd.f32 %v1672_v36, %v644_v39  ;;  %v648_v49 = vld [vmem:[%s2260_s5 + $0xee8] sm:$0xff]  ;;  %v649_v50 = vld [vmem:[%s2260_s5 + $0xef0] sm:$0xff]  ;;  %v1029_v52 = vadd.f32 %v1028_v40, %v645_v43  ;;  %v1158_v53 = vadd.f32 %v1157_v41, %v646_v44 }
  0xdb   : > { %v650_v51 = vld [vmem:[%s2260_s5 + $0xef8] sm:$0xff]  ;;  %v1287_v54 = vadd.f32 %v1286_v42, %v647_v45  ;;  %v651_v55 = vld [vmem:[%s2260_s5 + $0xf00] sm:$0xff]  ;;  %v652_v56 = vld [vmem:[%s2260_s5 + $0xf08] sm:$0xff]  ;;  %v1416_v58 = vadd.f32 %v1415_v46, %v648_v49  ;;  %v1545_v59 = vadd.f32 %v1544_v47, %v649_v50 }
  0xdc   : > { %v653_v57 = vld [vmem:[%s2260_s5 + $0xf10] sm:$0xff]  ;;  %v1674_v60 = vadd.f32 %v1673_v48, %v650_v51  ;;  %v654_v61 = vld [vmem:[%s2260_s5 + $0xf18] sm:$0xff]  ;;  %v655_v62 = vld [vmem:[%s2260_s5 + $0xf20] sm:$0xff]  ;;  %v1030_v0 = vadd.f32 %v1029_v52, %v651_v55  ;;  %v1159_v1 = vadd.f32 %v1158_v53, %v652_v56 }
  0xdd   : > { %v656_v63 = vld [vmem:[%s2260_s5 + $0xf28] sm:$0xff]  ;;  %v1288_v2 = vadd.f32 %v1287_v54, %v653_v57  ;;  %v657_v3 = vld [vmem:[%s2260_s5 + $0xf30] sm:$0xff]  ;;  %v658_v4 = vld [vmem:[%s2260_s5 + $0xf38] sm:$0xff]  ;;  %v1417_v6 = vadd.f32 %v1416_v58, %v654_v61  ;;  %v1546_v7 = vadd.f32 %v1545_v59, %v655_v62 }
  0xde   : > { %v659_v5 = vld [vmem:[%s2260_s5 + $0xf40] sm:$0xff]  ;;  %v1675_v8 = vadd.f32 %v1674_v60, %v656_v63  ;;  %v660_v9 = vld [vmem:[%s2260_s5 + $0xf48] sm:$0xff]  ;;  %v661_v10 = vld [vmem:[%s2260_s5 + $0xf50] sm:$0xff]  ;;  %v1031_v12 = vadd.f32 %v1030_v0, %v657_v3  ;;  %v1160_v13 = vadd.f32 %v1159_v1, %v658_v4 }
  0xdf   : > { %v662_v11 = vld [vmem:[%s2260_s5 + $0xf58] sm:$0xff]  ;;  %v1289_v14 = vadd.f32 %v1288_v2, %v659_v5  ;;  %v663_v15 = vld [vmem:[%s2260_s5 + $0xf60] sm:$0xff]  ;;  %v664_v16 = vld [vmem:[%s2260_s5 + $0xf68] sm:$0xff]  ;;  %v1418_v18 = vadd.f32 %v1417_v6, %v660_v9  ;;  %v1547_v19 = vadd.f32 %v1546_v7, %v661_v10 }
  0xe0   : > { %v665_v17 = vld [vmem:[%s2260_s5 + $0xf70] sm:$0xff]  ;;  %v1676_v20 = vadd.f32 %v1675_v8, %v662_v11  ;;  %v666_v21 = vld [vmem:[%s2260_s5 + $0xf78] sm:$0xff]  ;;  %v667_v22 = vld [vmem:[%s2260_s5 + $0xf80] sm:$0xff]  ;;  %v1032_v24 = vadd.f32 %v1031_v12, %v663_v15  ;;  %v1161_v25 = vadd.f32 %v1160_v13, %v664_v16 }
  0xe1   : > { %v668_v23 = vld [vmem:[%s2260_s5 + $0xf88] sm:$0xff]  ;;  %v1290_v26 = vadd.f32 %v1289_v14, %v665_v17  ;;  %v669_v27 = vld [vmem:[%s2260_s5 + $0xf90] sm:$0xff]  ;;  %v670_v28 = vld [vmem:[%s2260_s5 + $0xf98] sm:$0xff]  ;;  %v1419_v30 = vadd.f32 %v1418_v18, %v666_v21  ;;  %v1548_v31 = vadd.f32 %v1547_v19, %v667_v22 }
  0xe2   : > { %v671_v29 = vld [vmem:[%s2260_s5 + $0xfa0] sm:$0xff]  ;;  %v1677_v32 = vadd.f32 %v1676_v20, %v668_v23  ;;  %v672_v33 = vld [vmem:[%s2260_s5 + $0xfa8] sm:$0xff]  ;;  %v673_v34 = vld [vmem:[%s2260_s5 + $0xfb0] sm:$0xff]  ;;  %v1033_v36 = vadd.f32 %v1032_v24, %v669_v27  ;;  %v1162_v37 = vadd.f32 %v1161_v25, %v670_v28 }
  0xe3   : > { %v674_v35 = vld [vmem:[%s2260_s5 + $0xfb8] sm:$0xff]  ;;  %v1291_v38 = vadd.f32 %v1290_v26, %v671_v29  ;;  %v675_v39 = vld [vmem:[%s2260_s5 + $0xfc0] sm:$0xff]  ;;  %v676_v40 = vld [vmem:[%s2260_s5 + $0xfc8] sm:$0xff]  ;;  %v1420_v42 = vadd.f32 %v1419_v30, %v672_v33  ;;  %v1549_v43 = vadd.f32 %v1548_v31, %v673_v34 }
  0xe4   : > { %v677_v41 = vld [vmem:[%s2260_s5 + $0xfd0] sm:$0xff]  ;;  %v1678_v44 = vadd.f32 %v1677_v32, %v674_v35  ;;  %v678_v45 = vld [vmem:[%s2260_s5 + $0xfd8] sm:$0xff]  ;;  %v679_v46 = vld [vmem:[%s2260_s5 + $0xfe0] sm:$0xff]  ;;  %v1034_v48 = vadd.f32 %v1033_v36, %v675_v39  ;;  %v1163_v49 = vadd.f32 %v1162_v37, %v676_v40 }
  0xe5   : > { %v680_v47 = vld [vmem:[%s2260_s5 + $0xfe8] sm:$0xff]  ;;  %v1292_v50 = vadd.f32 %v1291_v38, %v677_v41  ;;  %v681_v51 = vld [vmem:[%s2260_s5 + $0xff0] sm:$0xff]  ;;  %v682_v52 = vld [vmem:[%s2260_s5 + $0xff8] sm:$0xff]  ;;  %v1421_v54 = vadd.f32 %v1420_v42, %v678_v45  ;;  %v1550_v55 = vadd.f32 %v1549_v43, %v679_v46 }
  0xe6   : > { %v683_v53 = vld [vmem:[%s2260_s5 + $0x1000] sm:$0xff]  ;;  %v1679_v56 = vadd.f32 %v1678_v44, %v680_v47  ;;  %v684_v57 = vld [vmem:[%s2260_s5 + $0x1008] sm:$0xff]  ;;  %v685_v58 = vld [vmem:[%s2260_s5 + $0x1010] sm:$0xff]  ;;  %v1035_v60 = vadd.f32 %v1034_v48, %v681_v51  ;;  %v1164_v61 = vadd.f32 %v1163_v49, %v682_v52 }
  0xe7   : > { %v686_v59 = vld [vmem:[%s2260_s5 + $0x1018] sm:$0xff]  ;;  %v1293_v62 = vadd.f32 %v1292_v50, %v683_v53  ;;  %v687_v63 = vld [vmem:[%s2260_s5 + $0x1020] sm:$0xff]  ;;  %v688_v0 = vld [vmem:[%s2260_s5 + $0x1028] sm:$0xff]  ;;  %v1422_v2 = vadd.f32 %v1421_v54, %v684_v57  ;;  %v1551_v3 = vadd.f32 %v1550_v55, %v685_v58 }
  0xe8   : > { %v689_v1 = vld [vmem:[%s2260_s5 + $0x1030] sm:$0xff]  ;;  %v1680_v4 = vadd.f32 %v1679_v56, %v686_v59  ;;  %v690_v5 = vld [vmem:[%s2260_s5 + $0x1038] sm:$0xff]  ;;  %v691_v6 = vld [vmem:[%s2260_s5 + $0x1040] sm:$0xff]  ;;  %v1036_v8 = vadd.f32 %v1035_v60, %v687_v63  ;;  %v1165_v9 = vadd.f32 %v1164_v61, %v688_v0 }
  0xe9   : > { %v692_v7 = vld [vmem:[%s2260_s5 + $0x1048] sm:$0xff]  ;;  %v1294_v10 = vadd.f32 %v1293_v62, %v689_v1  ;;  %v693_v11 = vld [vmem:[%s2260_s5 + $0x1050] sm:$0xff]  ;;  %v694_v12 = vld [vmem:[%s2260_s5 + $0x1058] sm:$0xff]  ;;  %v1423_v14 = vadd.f32 %v1422_v2, %v690_v5  ;;  %v1552_v15 = vadd.f32 %v1551_v3, %v691_v6 }
  0xea   : > { %v695_v13 = vld [vmem:[%s2260_s5 + $0x1060] sm:$0xff]  ;;  %v1681_v16 = vadd.f32 %v1680_v4, %v692_v7  ;;  %v696_v17 = vld [vmem:[%s2260_s5 + $0x1068] sm:$0xff]  ;;  %v697_v18 = vld [vmem:[%s2260_s5 + $0x1070] sm:$0xff]  ;;  %v1037_v20 = vadd.f32 %v1036_v8, %v693_v11  ;;  %v1166_v21 = vadd.f32 %v1165_v9, %v694_v12 }
  0xeb   : > { %v698_v19 = vld [vmem:[%s2260_s5 + $0x1078] sm:$0xff]  ;;  %v1295_v22 = vadd.f32 %v1294_v10, %v695_v13  ;;  %v699_v23 = vld [vmem:[%s2260_s5 + $0x1080] sm:$0xff]  ;;  %v700_v24 = vld [vmem:[%s2260_s5 + $0x1088] sm:$0xff]  ;;  %v1424_v26 = vadd.f32 %v1423_v14, %v696_v17  ;;  %v1553_v27 = vadd.f32 %v1552_v15, %v697_v18 }
  0xec   : > { %v701_v25 = vld [vmem:[%s2260_s5 + $0x1090] sm:$0xff]  ;;  %v1682_v28 = vadd.f32 %v1681_v16, %v698_v19  ;;  %v702_v29 = vld [vmem:[%s2260_s5 + $0x1098] sm:$0xff]  ;;  %v703_v30 = vld [vmem:[%s2260_s5 + $0x10a0] sm:$0xff]  ;;  %v1038_v32 = vadd.f32 %v1037_v20, %v699_v23  ;;  %v1167_v33 = vadd.f32 %v1166_v21, %v700_v24 }
  0xed   : > { %v704_v31 = vld [vmem:[%s2260_s5 + $0x10a8] sm:$0xff]  ;;  %v1296_v34 = vadd.f32 %v1295_v22, %v701_v25  ;;  %v705_v35 = vld [vmem:[%s2260_s5 + $0x10b0] sm:$0xff]  ;;  %v706_v36 = vld [vmem:[%s2260_s5 + $0x10b8] sm:$0xff]  ;;  %v1425_v38 = vadd.f32 %v1424_v26, %v702_v29  ;;  %v1554_v39 = vadd.f32 %v1553_v27, %v703_v30 }
  0xee   : > { %v707_v37 = vld [vmem:[%s2260_s5 + $0x10c0] sm:$0xff]  ;;  %v1683_v40 = vadd.f32 %v1682_v28, %v704_v31  ;;  %v708_v41 = vld [vmem:[%s2260_s5 + $0x10c8] sm:$0xff]  ;;  %v709_v42 = vld [vmem:[%s2260_s5 + $0x10d0] sm:$0xff]  ;;  %v1039_v44 = vadd.f32 %v1038_v32, %v705_v35  ;;  %v1168_v45 = vadd.f32 %v1167_v33, %v706_v36 }
  0xef   : > { %v710_v43 = vld [vmem:[%s2260_s5 + $0x10d8] sm:$0xff]  ;;  %v1297_v46 = vadd.f32 %v1296_v34, %v707_v37  ;;  %v711_v47 = vld [vmem:[%s2260_s5 + $0x10e0] sm:$0xff]  ;;  %v712_v48 = vld [vmem:[%s2260_s5 + $0x10e8] sm:$0xff]  ;;  %v1426_v50 = vadd.f32 %v1425_v38, %v708_v41  ;;  %v1555_v51 = vadd.f32 %v1554_v39, %v709_v42 }
  0xf0   : > { %v713_v49 = vld [vmem:[%s2260_s5 + $0x10f0] sm:$0xff]  ;;  %v1684_v52 = vadd.f32 %v1683_v40, %v710_v43  ;;  %v714_v53 = vld [vmem:[%s2260_s5 + $0x10f8] sm:$0xff]  ;;  %v715_v54 = vld [vmem:[%s2260_s5 + $0x1100] sm:$0xff]  ;;  %v1040_v56 = vadd.f32 %v1039_v44, %v711_v47  ;;  %v1169_v57 = vadd.f32 %v1168_v45, %v712_v48 }
  0xf1   : > { %v716_v55 = vld [vmem:[%s2260_s5 + $0x1108] sm:$0xff]  ;;  %v1298_v58 = vadd.f32 %v1297_v46, %v713_v49  ;;  %v717_v59 = vld [vmem:[%s2260_s5 + $0x1110] sm:$0xff]  ;;  %v718_v60 = vld [vmem:[%s2260_s5 + $0x1118] sm:$0xff]  ;;  %v1427_v62 = vadd.f32 %v1426_v50, %v714_v53  ;;  %v1556_v63 = vadd.f32 %v1555_v51, %v715_v54 }
  0xf2   : > { %v719_v61 = vld [vmem:[%s2260_s5 + $0x1120] sm:$0xff]  ;;  %v1685_v0 = vadd.f32 %v1684_v52, %v716_v55  ;;  %v720_v1 = vld [vmem:[%s2260_s5 + $0x1128] sm:$0xff]  ;;  %v721_v2 = vld [vmem:[%s2260_s5 + $0x1130] sm:$0xff]  ;;  %v1041_v4 = vadd.f32 %v1040_v56, %v717_v59  ;;  %v1170_v5 = vadd.f32 %v1169_v57, %v718_v60 }
  0xf3   : > { %v722_v3 = vld [vmem:[%s2260_s5 + $0x1138] sm:$0xff]  ;;  %v1299_v6 = vadd.f32 %v1298_v58, %v719_v61  ;;  %v723_v7 = vld [vmem:[%s2260_s5 + $0x1140] sm:$0xff]  ;;  %v724_v8 = vld [vmem:[%s2260_s5 + $0x1148] sm:$0xff]  ;;  %v1428_v10 = vadd.f32 %v1427_v62, %v720_v1  ;;  %v1557_v11 = vadd.f32 %v1556_v63, %v721_v2 }
  0xf4   : > { %v725_v9 = vld [vmem:[%s2260_s5 + $0x1150] sm:$0xff]  ;;  %v1686_v12 = vadd.f32 %v1685_v0, %v722_v3  ;;  %v726_v13 = vld [vmem:[%s2260_s5 + $0x1158] sm:$0xff]  ;;  %v727_v14 = vld [vmem:[%s2260_s5 + $0x1160] sm:$0xff]  ;;  %v1042_v16 = vadd.f32 %v1041_v4, %v723_v7  ;;  %v1171_v17 = vadd.f32 %v1170_v5, %v724_v8 }
  0xf5   : > { %v728_v15 = vld [vmem:[%s2260_s5 + $0x1168] sm:$0xff]  ;;  %v1300_v18 = vadd.f32 %v1299_v6, %v725_v9  ;;  %v729_v19 = vld [vmem:[%s2260_s5 + $0x1170] sm:$0xff]  ;;  %v730_v20 = vld [vmem:[%s2260_s5 + $0x1178] sm:$0xff]  ;;  %v1429_v22 = vadd.f32 %v1428_v10, %v726_v13  ;;  %v1558_v23 = vadd.f32 %v1557_v11, %v727_v14 }
  0xf6   : > { %v731_v21 = vld [vmem:[%s2260_s5 + $0x1180] sm:$0xff]  ;;  %v1687_v24 = vadd.f32 %v1686_v12, %v728_v15  ;;  %v732_v25 = vld [vmem:[%s2260_s5 + $0x1188] sm:$0xff]  ;;  %v733_v26 = vld [vmem:[%s2260_s5 + $0x1190] sm:$0xff]  ;;  %v1043_v28 = vadd.f32 %v1042_v16, %v729_v19  ;;  %v1172_v29 = vadd.f32 %v1171_v17, %v730_v20 }
  0xf7   : > { %v734_v27 = vld [vmem:[%s2260_s5 + $0x1198] sm:$0xff]  ;;  %v1301_v30 = vadd.f32 %v1300_v18, %v731_v21  ;;  %v735_v31 = vld [vmem:[%s2260_s5 + $0x11a0] sm:$0xff]  ;;  %v736_v32 = vld [vmem:[%s2260_s5 + $0x11a8] sm:$0xff]  ;;  %v1430_v34 = vadd.f32 %v1429_v22, %v732_v25  ;;  %v1559_v35 = vadd.f32 %v1558_v23, %v733_v26 }
  0xf8   : > { %v737_v33 = vld [vmem:[%s2260_s5 + $0x11b0] sm:$0xff]  ;;  %v1688_v36 = vadd.f32 %v1687_v24, %v734_v27  ;;  %v738_v37 = vld [vmem:[%s2260_s5 + $0x11b8] sm:$0xff]  ;;  %v739_v38 = vld [vmem:[%s2260_s5 + $0x11c0] sm:$0xff]  ;;  %v1044_v40 = vadd.f32 %v1043_v28, %v735_v31  ;;  %v1173_v41 = vadd.f32 %v1172_v29, %v736_v32 }
  0xf9   : > { %v740_v39 = vld [vmem:[%s2260_s5 + $0x11c8] sm:$0xff]  ;;  %v1302_v42 = vadd.f32 %v1301_v30, %v737_v33  ;;  %v741_v43 = vld [vmem:[%s2260_s5 + $0x11d0] sm:$0xff]  ;;  %v742_v44 = vld [vmem:[%s2260_s5 + $0x11d8] sm:$0xff]  ;;  %v1431_v46 = vadd.f32 %v1430_v34, %v738_v37  ;;  %v1560_v47 = vadd.f32 %v1559_v35, %v739_v38 }
  0xfa   : > { %v743_v45 = vld [vmem:[%s2260_s5 + $0x11e0] sm:$0xff]  ;;  %v1689_v48 = vadd.f32 %v1688_v36, %v740_v39  ;;  %v744_v49 = vld [vmem:[%s2260_s5 + $0x11e8] sm:$0xff]  ;;  %v745_v50 = vld [vmem:[%s2260_s5 + $0x11f0] sm:$0xff]  ;;  %v1045_v52 = vadd.f32 %v1044_v40, %v741_v43  ;;  %v1174_v53 = vadd.f32 %v1173_v41, %v742_v44 }
  0xfb   : > { %v746_v51 = vld [vmem:[%s2260_s5 + $0x11f8] sm:$0xff]  ;;  %v1303_v54 = vadd.f32 %v1302_v42, %v743_v45  ;;  %v747_v55 = vld [vmem:[%s2260_s5 + $0x1200] sm:$0xff]  ;;  %v748_v56 = vld [vmem:[%s2260_s5 + $0x1208] sm:$0xff]  ;;  %v1432_v58 = vadd.f32 %v1431_v46, %v744_v49  ;;  %v1561_v59 = vadd.f32 %v1560_v47, %v745_v50 }
  0xfc   : > { %v749_v57 = vld [vmem:[%s2260_s5 + $0x1210] sm:$0xff]  ;;  %v1690_v60 = vadd.f32 %v1689_v48, %v746_v51  ;;  %v750_v61 = vld [vmem:[%s2260_s5 + $0x1218] sm:$0xff]  ;;  %v751_v62 = vld [vmem:[%s2260_s5 + $0x1220] sm:$0xff]  ;;  %v1046_v0 = vadd.f32 %v1045_v52, %v747_v55  ;;  %v1175_v1 = vadd.f32 %v1174_v53, %v748_v56 }
  0xfd   : > { %v752_v63 = vld [vmem:[%s2260_s5 + $0x1228] sm:$0xff]  ;;  %v1304_v2 = vadd.f32 %v1303_v54, %v749_v57  ;;  %v753_v3 = vld [vmem:[%s2260_s5 + $0x1230] sm:$0xff]  ;;  %v754_v4 = vld [vmem:[%s2260_s5 + $0x1238] sm:$0xff]  ;;  %v1433_v6 = vadd.f32 %v1432_v58, %v750_v61  ;;  %v1562_v7 = vadd.f32 %v1561_v59, %v751_v62 }
  0xfe   : > { %v755_v5 = vld [vmem:[%s2260_s5 + $0x1240] sm:$0xff]  ;;  %v1691_v8 = vadd.f32 %v1690_v60, %v752_v63  ;;  %v756_v9 = vld [vmem:[%s2260_s5 + $0x1248] sm:$0xff]  ;;  %v757_v10 = vld [vmem:[%s2260_s5 + $0x1250] sm:$0xff]  ;;  %v1047_v12 = vadd.f32 %v1046_v0, %v753_v3  ;;  %v1176_v13 = vadd.f32 %v1175_v1, %v754_v4 }
  0xff   : > { %v758_v11 = vld [vmem:[%s2260_s5 + $0x1258] sm:$0xff]  ;;  %v1305_v14 = vadd.f32 %v1304_v2, %v755_v5  ;;  %v759_v15 = vld [vmem:[%s2260_s5 + $0x1260] sm:$0xff]  ;;  %v760_v16 = vld [vmem:[%s2260_s5 + $0x1268] sm:$0xff]  ;;  %v1434_v18 = vadd.f32 %v1433_v6, %v756_v9  ;;  %v1563_v19 = vadd.f32 %v1562_v7, %v757_v10 }
 0x100   : > { %v761_v17 = vld [vmem:[%s2260_s5 + $0x1270] sm:$0xff]  ;;  %v1692_v20 = vadd.f32 %v1691_v8, %v758_v11  ;;  %v762_v21 = vld [vmem:[%s2260_s5 + $0x1278] sm:$0xff]  ;;  %v763_v22 = vld [vmem:[%s2260_s5 + $0x1280] sm:$0xff]  ;;  %v1048_v24 = vadd.f32 %v1047_v12, %v759_v15  ;;  %v1177_v25 = vadd.f32 %v1176_v13, %v760_v16 }
 0x101   : > { %v764_v23 = vld [vmem:[%s2260_s5 + $0x1288] sm:$0xff]  ;;  %v1306_v26 = vadd.f32 %v1305_v14, %v761_v17  ;;  %v765_v27 = vld [vmem:[%s2260_s5 + $0x1290] sm:$0xff]  ;;  %v766_v28 = vld [vmem:[%s2260_s5 + $0x1298] sm:$0xff]  ;;  %v1435_v30 = vadd.f32 %v1434_v18, %v762_v21  ;;  %v1564_v31 = vadd.f32 %v1563_v19, %v763_v22 }
 0x102   : > { %v767_v29 = vld [vmem:[%s2260_s5 + $0x12a0] sm:$0xff]  ;;  %v1693_v32 = vadd.f32 %v1692_v20, %v764_v23  ;;  %v768_v33 = vld [vmem:[%s2260_s5 + $0x12a8] sm:$0xff]  ;;  %v769_v34 = vld [vmem:[%s2260_s5 + $0x12b0] sm:$0xff]  ;;  %v1049_v36 = vadd.f32 %v1048_v24, %v765_v27  ;;  %v1178_v37 = vadd.f32 %v1177_v25, %v766_v28 }
 0x103   : > { %v770_v35 = vld [vmem:[%s2260_s5 + $0x12b8] sm:$0xff]  ;;  %v1307_v38 = vadd.f32 %v1306_v26, %v767_v29  ;;  %v771_v39 = vld [vmem:[%s2260_s5 + $0x12c0] sm:$0xff]  ;;  %v772_v40 = vld [vmem:[%s2260_s5 + $0x12c8] sm:$0xff]  ;;  %v1436_v42 = vadd.f32 %v1435_v30, %v768_v33  ;;  %v1565_v43 = vadd.f32 %v1564_v31, %v769_v34 }
 0x104   : > { %v773_v41 = vld [vmem:[%s2260_s5 + $0x12d0] sm:$0xff]  ;;  %v1694_v44 = vadd.f32 %v1693_v32, %v770_v35  ;;  %v774_v45 = vld [vmem:[%s2260_s5 + $0x12d8] sm:$0xff]  ;;  %v775_v46 = vld [vmem:[%s2260_s5 + $0x12e0] sm:$0xff]  ;;  %v1050_v48 = vadd.f32 %v1049_v36, %v771_v39  ;;  %v1179_v49 = vadd.f32 %v1178_v37, %v772_v40 }
 0x105   : > { %v776_v47 = vld [vmem:[%s2260_s5 + $0x12e8] sm:$0xff]  ;;  %v1308_v50 = vadd.f32 %v1307_v38, %v773_v41  ;;  %v777_v51 = vld [vmem:[%s2260_s5 + $0x12f0] sm:$0xff]  ;;  %v778_v52 = vld [vmem:[%s2260_s5 + $0x12f8] sm:$0xff]  ;;  %v1437_v54 = vadd.f32 %v1436_v42, %v774_v45  ;;  %v1566_v55 = vadd.f32 %v1565_v43, %v775_v46 }
 0x106   : > { %v779_v53 = vld [vmem:[%s2260_s5 + $0x1300] sm:$0xff]  ;;  %v1695_v56 = vadd.f32 %v1694_v44, %v776_v47  ;;  %v780_v57 = vld [vmem:[%s2260_s5 + $0x1308] sm:$0xff]  ;;  %v781_v58 = vld [vmem:[%s2260_s5 + $0x1310] sm:$0xff]  ;;  %v1051_v60 = vadd.f32 %v1050_v48, %v777_v51  ;;  %v1180_v61 = vadd.f32 %v1179_v49, %v778_v52 }
 0x107   : > { %v782_v59 = vld [vmem:[%s2260_s5 + $0x1318] sm:$0xff]  ;;  %v1309_v62 = vadd.f32 %v1308_v50, %v779_v53  ;;  %v783_v63 = vld [vmem:[%s2260_s5 + $0x1320] sm:$0xff]  ;;  %v784_v0 = vld [vmem:[%s2260_s5 + $0x1328] sm:$0xff]  ;;  %v1438_v2 = vadd.f32 %v1437_v54, %v780_v57  ;;  %v1567_v3 = vadd.f32 %v1566_v55, %v781_v58 }
 0x108   : > { %v785_v1 = vld [vmem:[%s2260_s5 + $0x1330] sm:$0xff]  ;;  %v1696_v4 = vadd.f32 %v1695_v56, %v782_v59  ;;  %v786_v5 = vld [vmem:[%s2260_s5 + $0x1338] sm:$0xff]  ;;  %v787_v6 = vld [vmem:[%s2260_s5 + $0x1340] sm:$0xff]  ;;  %v1052_v8 = vadd.f32 %v1051_v60, %v783_v63  ;;  %v1181_v9 = vadd.f32 %v1180_v61, %v784_v0 }
 0x109   : > { %v788_v7 = vld [vmem:[%s2260_s5 + $0x1348] sm:$0xff]  ;;  %v1310_v10 = vadd.f32 %v1309_v62, %v785_v1  ;;  %v789_v11 = vld [vmem:[%s2260_s5 + $0x1350] sm:$0xff]  ;;  %v790_v12 = vld [vmem:[%s2260_s5 + $0x1358] sm:$0xff]  ;;  %v1439_v14 = vadd.f32 %v1438_v2, %v786_v5  ;;  %v1568_v15 = vadd.f32 %v1567_v3, %v787_v6 }
 0x10a   : > { %v791_v13 = vld [vmem:[%s2260_s5 + $0x1360] sm:$0xff]  ;;  %v1697_v16 = vadd.f32 %v1696_v4, %v788_v7  ;;  %v792_v17 = vld [vmem:[%s2260_s5 + $0x1368] sm:$0xff]  ;;  %v793_v18 = vld [vmem:[%s2260_s5 + $0x1370] sm:$0xff]  ;;  %v1053_v20 = vadd.f32 %v1052_v8, %v789_v11  ;;  %v1182_v21 = vadd.f32 %v1181_v9, %v790_v12 }
 0x10b   : > { %v794_v19 = vld [vmem:[%s2260_s5 + $0x1378] sm:$0xff]  ;;  %v1311_v22 = vadd.f32 %v1310_v10, %v791_v13  ;;  %v795_v23 = vld [vmem:[%s2260_s5 + $0x1380] sm:$0xff]  ;;  %v796_v24 = vld [vmem:[%s2260_s5 + $0x1388] sm:$0xff]  ;;  %v1440_v26 = vadd.f32 %v1439_v14, %v792_v17  ;;  %v1569_v27 = vadd.f32 %v1568_v15, %v793_v18 }
 0x10c   : > { %v797_v25 = vld [vmem:[%s2260_s5 + $0x1390] sm:$0xff]  ;;  %v1698_v28 = vadd.f32 %v1697_v16, %v794_v19  ;;  %v798_v29 = vld [vmem:[%s2260_s5 + $0x1398] sm:$0xff]  ;;  %v799_v30 = vld [vmem:[%s2260_s5 + $0x13a0] sm:$0xff]  ;;  %v1054_v32 = vadd.f32 %v1053_v20, %v795_v23  ;;  %v1183_v33 = vadd.f32 %v1182_v21, %v796_v24 }
 0x10d   : > { %v800_v31 = vld [vmem:[%s2260_s5 + $0x13a8] sm:$0xff]  ;;  %v1312_v34 = vadd.f32 %v1311_v22, %v797_v25  ;;  %v801_v35 = vld [vmem:[%s2260_s5 + $0x13b0] sm:$0xff]  ;;  %v802_v36 = vld [vmem:[%s2260_s5 + $0x13b8] sm:$0xff]  ;;  %v1441_v38 = vadd.f32 %v1440_v26, %v798_v29  ;;  %v1570_v39 = vadd.f32 %v1569_v27, %v799_v30 }
 0x10e   : > { %v803_v37 = vld [vmem:[%s2260_s5 + $0x13c0] sm:$0xff]  ;;  %v1699_v40 = vadd.f32 %v1698_v28, %v800_v31  ;;  %v804_v41 = vld [vmem:[%s2260_s5 + $0x13c8] sm:$0xff]  ;;  %v805_v42 = vld [vmem:[%s2260_s5 + $0x13d0] sm:$0xff]  ;;  %v1055_v44 = vadd.f32 %v1054_v32, %v801_v35  ;;  %v1184_v45 = vadd.f32 %v1183_v33, %v802_v36 }
 0x10f   : > { %v806_v43 = vld [vmem:[%s2260_s5 + $0x13d8] sm:$0xff]  ;;  %v1313_v46 = vadd.f32 %v1312_v34, %v803_v37  ;;  %v807_v47 = vld [vmem:[%s2260_s5 + $0x13e0] sm:$0xff]  ;;  %v808_v48 = vld [vmem:[%s2260_s5 + $0x13e8] sm:$0xff]  ;;  %v1442_v50 = vadd.f32 %v1441_v38, %v804_v41  ;;  %v1571_v51 = vadd.f32 %v1570_v39, %v805_v42 }
 0x110   : > { %v809_v49 = vld [vmem:[%s2260_s5 + $0x13f0] sm:$0xff]  ;;  %v1700_v52 = vadd.f32 %v1699_v40, %v806_v43  ;;  %v810_v53 = vld [vmem:[%s2260_s5 + $0x13f8] sm:$0xff]  ;;  %v811_v54 = vld [vmem:[%s2260_s5 + $0x1400] sm:$0xff]  ;;  %v1056_v56 = vadd.f32 %v1055_v44, %v807_v47  ;;  %v1185_v57 = vadd.f32 %v1184_v45, %v808_v48 }
 0x111   : > { %v812_v55 = vld [vmem:[%s2260_s5 + $0x1408] sm:$0xff]  ;;  %v1314_v58 = vadd.f32 %v1313_v46, %v809_v49  ;;  %v813_v59 = vld [vmem:[%s2260_s5 + $0x1410] sm:$0xff]  ;;  %v814_v60 = vld [vmem:[%s2260_s5 + $0x1418] sm:$0xff]  ;;  %v1443_v62 = vadd.f32 %v1442_v50, %v810_v53  ;;  %v1572_v63 = vadd.f32 %v1571_v51, %v811_v54 }
 0x112   : > { %v815_v61 = vld [vmem:[%s2260_s5 + $0x1420] sm:$0xff]  ;;  %v1701_v0 = vadd.f32 %v1700_v52, %v812_v55  ;;  %v816_v1 = vld [vmem:[%s2260_s5 + $0x1428] sm:$0xff]  ;;  %v817_v2 = vld [vmem:[%s2260_s5 + $0x1430] sm:$0xff]  ;;  %v1057_v4 = vadd.f32 %v1056_v56, %v813_v59  ;;  %v1186_v5 = vadd.f32 %v1185_v57, %v814_v60 }
 0x113   : > { %v818_v3 = vld [vmem:[%s2260_s5 + $0x1438] sm:$0xff]  ;;  %v1315_v6 = vadd.f32 %v1314_v58, %v815_v61  ;;  %v819_v7 = vld [vmem:[%s2260_s5 + $0x1440] sm:$0xff]  ;;  %v820_v8 = vld [vmem:[%s2260_s5 + $0x1448] sm:$0xff]  ;;  %v1444_v10 = vadd.f32 %v1443_v62, %v816_v1  ;;  %v1573_v11 = vadd.f32 %v1572_v63, %v817_v2 }
 0x114   : > { %v821_v9 = vld [vmem:[%s2260_s5 + $0x1450] sm:$0xff]  ;;  %v1702_v12 = vadd.f32 %v1701_v0, %v818_v3  ;;  %v822_v13 = vld [vmem:[%s2260_s5 + $0x1458] sm:$0xff]  ;;  %v823_v14 = vld [vmem:[%s2260_s5 + $0x1460] sm:$0xff]  ;;  %v1058_v16 = vadd.f32 %v1057_v4, %v819_v7  ;;  %v1187_v17 = vadd.f32 %v1186_v5, %v820_v8 }
 0x115   : > { %v824_v15 = vld [vmem:[%s2260_s5 + $0x1468] sm:$0xff]  ;;  %v1316_v18 = vadd.f32 %v1315_v6, %v821_v9  ;;  %v825_v19 = vld [vmem:[%s2260_s5 + $0x1470] sm:$0xff]  ;;  %v826_v20 = vld [vmem:[%s2260_s5 + $0x1478] sm:$0xff]  ;;  %v1445_v22 = vadd.f32 %v1444_v10, %v822_v13  ;;  %v1574_v23 = vadd.f32 %v1573_v11, %v823_v14 }
 0x116   : > { %v827_v21 = vld [vmem:[%s2260_s5 + $0x1480] sm:$0xff]  ;;  %v1703_v24 = vadd.f32 %v1702_v12, %v824_v15  ;;  %v828_v25 = vld [vmem:[%s2260_s5 + $0x1488] sm:$0xff]  ;;  %v829_v26 = vld [vmem:[%s2260_s5 + $0x1490] sm:$0xff]  ;;  %v1059_v28 = vadd.f32 %v1058_v16, %v825_v19  ;;  %v1188_v29 = vadd.f32 %v1187_v17, %v826_v20 }
 0x117   : > { %v830_v27 = vld [vmem:[%s2260_s5 + $0x1498] sm:$0xff]  ;;  %v1317_v30 = vadd.f32 %v1316_v18, %v827_v21  ;;  %v831_v31 = vld [vmem:[%s2260_s5 + $0x14a0] sm:$0xff]  ;;  %v832_v32 = vld [vmem:[%s2260_s5 + $0x14a8] sm:$0xff]  ;;  %v1446_v34 = vadd.f32 %v1445_v22, %v828_v25  ;;  %v1575_v35 = vadd.f32 %v1574_v23, %v829_v26 }
 0x118   : > { %v833_v33 = vld [vmem:[%s2260_s5 + $0x14b0] sm:$0xff]  ;;  %v1704_v36 = vadd.f32 %v1703_v24, %v830_v27  ;;  %v834_v37 = vld [vmem:[%s2260_s5 + $0x14b8] sm:$0xff]  ;;  %v835_v38 = vld [vmem:[%s2260_s5 + $0x14c0] sm:$0xff]  ;;  %v1060_v40 = vadd.f32 %v1059_v28, %v831_v31  ;;  %v1189_v41 = vadd.f32 %v1188_v29, %v832_v32 }
 0x119   : > { %v836_v39 = vld [vmem:[%s2260_s5 + $0x14c8] sm:$0xff]  ;;  %v1318_v42 = vadd.f32 %v1317_v30, %v833_v33  ;;  %v837_v43 = vld [vmem:[%s2260_s5 + $0x14d0] sm:$0xff]  ;;  %v838_v44 = vld [vmem:[%s2260_s5 + $0x14d8] sm:$0xff]  ;;  %v1447_v46 = vadd.f32 %v1446_v34, %v834_v37  ;;  %v1576_v47 = vadd.f32 %v1575_v35, %v835_v38 }
 0x11a   : > { %v839_v45 = vld [vmem:[%s2260_s5 + $0x14e0] sm:$0xff]  ;;  %v1705_v48 = vadd.f32 %v1704_v36, %v836_v39  ;;  %v840_v49 = vld [vmem:[%s2260_s5 + $0x14e8] sm:$0xff]  ;;  %v841_v50 = vld [vmem:[%s2260_s5 + $0x14f0] sm:$0xff]  ;;  %v1061_v52 = vadd.f32 %v1060_v40, %v837_v43  ;;  %v1190_v53 = vadd.f32 %v1189_v41, %v838_v44 }
 0x11b   : > { %v842_v51 = vld [vmem:[%s2260_s5 + $0x14f8] sm:$0xff]  ;;  %v1319_v54 = vadd.f32 %v1318_v42, %v839_v45  ;;  %v843_v55 = vld [vmem:[%s2260_s5 + $0x1500] sm:$0xff]  ;;  %v844_v56 = vld [vmem:[%s2260_s5 + $0x1508] sm:$0xff]  ;;  %v1448_v58 = vadd.f32 %v1447_v46, %v840_v49  ;;  %v1577_v59 = vadd.f32 %v1576_v47, %v841_v50 }
 0x11c   : > { %v845_v57 = vld [vmem:[%s2260_s5 + $0x1510] sm:$0xff]  ;;  %v1706_v60 = vadd.f32 %v1705_v48, %v842_v51  ;;  %v846_v61 = vld [vmem:[%s2260_s5 + $0x1518] sm:$0xff]  ;;  %v847_v62 = vld [vmem:[%s2260_s5 + $0x1520] sm:$0xff]  ;;  %v1062_v0 = vadd.f32 %v1061_v52, %v843_v55  ;;  %v1191_v1 = vadd.f32 %v1190_v53, %v844_v56 }
 0x11d   : > { %v848_v63 = vld [vmem:[%s2260_s5 + $0x1528] sm:$0xff]  ;;  %v1320_v2 = vadd.f32 %v1319_v54, %v845_v57  ;;  %v849_v3 = vld [vmem:[%s2260_s5 + $0x1530] sm:$0xff]  ;;  %v850_v4 = vld [vmem:[%s2260_s5 + $0x1538] sm:$0xff]  ;;  %v1449_v6 = vadd.f32 %v1448_v58, %v846_v61  ;;  %v1578_v7 = vadd.f32 %v1577_v59, %v847_v62 }
 0x11e   : > { %v851_v5 = vld [vmem:[%s2260_s5 + $0x1540] sm:$0xff]  ;;  %v1707_v8 = vadd.f32 %v1706_v60, %v848_v63  ;;  %v852_v9 = vld [vmem:[%s2260_s5 + $0x1548] sm:$0xff]  ;;  %v853_v10 = vld [vmem:[%s2260_s5 + $0x1550] sm:$0xff]  ;;  %v1063_v12 = vadd.f32 %v1062_v0, %v849_v3  ;;  %v1192_v13 = vadd.f32 %v1191_v1, %v850_v4 }
 0x11f   : > { %v854_v11 = vld [vmem:[%s2260_s5 + $0x1558] sm:$0xff]  ;;  %v1321_v14 = vadd.f32 %v1320_v2, %v851_v5  ;;  %v855_v15 = vld [vmem:[%s2260_s5 + $0x1560] sm:$0xff]  ;;  %v856_v16 = vld [vmem:[%s2260_s5 + $0x1568] sm:$0xff]  ;;  %v1450_v18 = vadd.f32 %v1449_v6, %v852_v9  ;;  %v1579_v19 = vadd.f32 %v1578_v7, %v853_v10 }
 0x120   : > { %v857_v17 = vld [vmem:[%s2260_s5 + $0x1570] sm:$0xff]  ;;  %v1708_v20 = vadd.f32 %v1707_v8, %v854_v11  ;;  %v858_v21 = vld [vmem:[%s2260_s5 + $0x1578] sm:$0xff]  ;;  %v859_v22 = vld [vmem:[%s2260_s5 + $0x1580] sm:$0xff]  ;;  %v1064_v24 = vadd.f32 %v1063_v12, %v855_v15  ;;  %v1193_v25 = vadd.f32 %v1192_v13, %v856_v16 }
 0x121   : > { %v860_v23 = vld [vmem:[%s2260_s5 + $0x1588] sm:$0xff]  ;;  %v1322_v26 = vadd.f32 %v1321_v14, %v857_v17  ;;  %v861_v27 = vld [vmem:[%s2260_s5 + $0x1590] sm:$0xff]  ;;  %v862_v28 = vld [vmem:[%s2260_s5 + $0x1598] sm:$0xff]  ;;  %v1451_v30 = vadd.f32 %v1450_v18, %v858_v21  ;;  %v1580_v31 = vadd.f32 %v1579_v19, %v859_v22 }
 0x122   : > { %v863_v29 = vld [vmem:[%s2260_s5 + $0x15a0] sm:$0xff]  ;;  %v1709_v32 = vadd.f32 %v1708_v20, %v860_v23  ;;  %v864_v33 = vld [vmem:[%s2260_s5 + $0x15a8] sm:$0xff]  ;;  %v865_v34 = vld [vmem:[%s2260_s5 + $0x15b0] sm:$0xff]  ;;  %v1065_v36 = vadd.f32 %v1064_v24, %v861_v27  ;;  %v1194_v37 = vadd.f32 %v1193_v25, %v862_v28 }
 0x123   : > { %v866_v35 = vld [vmem:[%s2260_s5 + $0x15b8] sm:$0xff]  ;;  %v1323_v38 = vadd.f32 %v1322_v26, %v863_v29  ;;  %v867_v39 = vld [vmem:[%s2260_s5 + $0x15c0] sm:$0xff]  ;;  %v868_v40 = vld [vmem:[%s2260_s5 + $0x15c8] sm:$0xff]  ;;  %v1452_v42 = vadd.f32 %v1451_v30, %v864_v33  ;;  %v1581_v43 = vadd.f32 %v1580_v31, %v865_v34 }
 0x124   : > { %v869_v41 = vld [vmem:[%s2260_s5 + $0x15d0] sm:$0xff]  ;;  %v1710_v44 = vadd.f32 %v1709_v32, %v866_v35  ;;  %v870_v45 = vld [vmem:[%s2260_s5 + $0x15d8] sm:$0xff]  ;;  %v871_v46 = vld [vmem:[%s2260_s5 + $0x15e0] sm:$0xff]  ;;  %v1066_v48 = vadd.f32 %v1065_v36, %v867_v39  ;;  %v1195_v49 = vadd.f32 %v1194_v37, %v868_v40 }
 0x125   : > { %v872_v47 = vld [vmem:[%s2260_s5 + $0x15e8] sm:$0xff]  ;;  %v1324_v50 = vadd.f32 %v1323_v38, %v869_v41  ;;  %v873_v51 = vld [vmem:[%s2260_s5 + $0x15f0] sm:$0xff]  ;;  %v874_v52 = vld [vmem:[%s2260_s5 + $0x15f8] sm:$0xff]  ;;  %v1453_v54 = vadd.f32 %v1452_v42, %v870_v45  ;;  %v1582_v55 = vadd.f32 %v1581_v43, %v871_v46 }
 0x126   : > { %v875_v53 = vld [vmem:[%s2260_s5 + $0x1600] sm:$0xff]  ;;  %v1711_v56 = vadd.f32 %v1710_v44, %v872_v47  ;;  %v876_v57 = vld [vmem:[%s2260_s5 + $0x1608] sm:$0xff]  ;;  %v877_v58 = vld [vmem:[%s2260_s5 + $0x1610] sm:$0xff]  ;;  %v1067_v60 = vadd.f32 %v1066_v48, %v873_v51  ;;  %v1196_v61 = vadd.f32 %v1195_v49, %v874_v52 }
 0x127   : > { %v878_v59 = vld [vmem:[%s2260_s5 + $0x1618] sm:$0xff]  ;;  %v1325_v62 = vadd.f32 %v1324_v50, %v875_v53  ;;  %v879_v63 = vld [vmem:[%s2260_s5 + $0x1620] sm:$0xff]  ;;  %v880_v0 = vld [vmem:[%s2260_s5 + $0x1628] sm:$0xff]  ;;  %v1454_v2 = vadd.f32 %v1453_v54, %v876_v57  ;;  %v1583_v3 = vadd.f32 %v1582_v55, %v877_v58 }
 0x128   : > { %v881_v1 = vld [vmem:[%s2260_s5 + $0x1630] sm:$0xff]  ;;  %v1712_v4 = vadd.f32 %v1711_v56, %v878_v59  ;;  %v882_v5 = vld [vmem:[%s2260_s5 + $0x1638] sm:$0xff]  ;;  %v883_v6 = vld [vmem:[%s2260_s5 + $0x1640] sm:$0xff]  ;;  %v1068_v8 = vadd.f32 %v1067_v60, %v879_v63  ;;  %v1197_v9 = vadd.f32 %v1196_v61, %v880_v0 }
 0x129   : > { %v884_v7 = vld [vmem:[%s2260_s5 + $0x1648] sm:$0xff]  ;;  %v1326_v10 = vadd.f32 %v1325_v62, %v881_v1  ;;  %v885_v11 = vld [vmem:[%s2260_s5 + $0x1650] sm:$0xff]  ;;  %v886_v12 = vld [vmem:[%s2260_s5 + $0x1658] sm:$0xff]  ;;  %v1455_v14 = vadd.f32 %v1454_v2, %v882_v5  ;;  %v1584_v15 = vadd.f32 %v1583_v3, %v883_v6 }
 0x12a   : > { %v887_v13 = vld [vmem:[%s2260_s5 + $0x1660] sm:$0xff]  ;;  %v1713_v16 = vadd.f32 %v1712_v4, %v884_v7  ;;  %v888_v17 = vld [vmem:[%s2260_s5 + $0x1668] sm:$0xff]  ;;  %v889_v18 = vld [vmem:[%s2260_s5 + $0x1670] sm:$0xff]  ;;  %v1069_v20 = vadd.f32 %v1068_v8, %v885_v11  ;;  %v1198_v21 = vadd.f32 %v1197_v9, %v886_v12 }
 0x12b   : > { %v890_v19 = vld [vmem:[%s2260_s5 + $0x1678] sm:$0xff]  ;;  %v1327_v22 = vadd.f32 %v1326_v10, %v887_v13  ;;  %v891_v23 = vld [vmem:[%s2260_s5 + $0x1680] sm:$0xff]  ;;  %v892_v24 = vld [vmem:[%s2260_s5 + $0x1688] sm:$0xff]  ;;  %v1456_v26 = vadd.f32 %v1455_v14, %v888_v17  ;;  %v1585_v27 = vadd.f32 %v1584_v15, %v889_v18 }
 0x12c   : > { %v893_v25 = vld [vmem:[%s2260_s5 + $0x1690] sm:$0xff]  ;;  %v1714_v28 = vadd.f32 %v1713_v16, %v890_v19  ;;  %v894_v29 = vld [vmem:[%s2260_s5 + $0x1698] sm:$0xff]  ;;  %v895_v30 = vld [vmem:[%s2260_s5 + $0x16a0] sm:$0xff]  ;;  %v1070_v32 = vadd.f32 %v1069_v20, %v891_v23  ;;  %v1199_v33 = vadd.f32 %v1198_v21, %v892_v24 }
 0x12d   : > { %v896_v31 = vld [vmem:[%s2260_s5 + $0x16a8] sm:$0xff]  ;;  %v1328_v34 = vadd.f32 %v1327_v22, %v893_v25  ;;  %v897_v35 = vld [vmem:[%s2260_s5 + $0x16b0] sm:$0xff]  ;;  %v898_v36 = vld [vmem:[%s2260_s5 + $0x16b8] sm:$0xff]  ;;  %v1457_v38 = vadd.f32 %v1456_v26, %v894_v29  ;;  %v1586_v39 = vadd.f32 %v1585_v27, %v895_v30 }
 0x12e   : > { %v899_v37 = vld [vmem:[%s2260_s5 + $0x16c0] sm:$0xff]  ;;  %v1715_v40 = vadd.f32 %v1714_v28, %v896_v31  ;;  %v900_v41 = vld [vmem:[%s2260_s5 + $0x16c8] sm:$0xff]  ;;  %v901_v42 = vld [vmem:[%s2260_s5 + $0x16d0] sm:$0xff]  ;;  %v1071_v44 = vadd.f32 %v1070_v32, %v897_v35  ;;  %v1200_v45 = vadd.f32 %v1199_v33, %v898_v36 }
 0x12f   : > { %v902_v43 = vld [vmem:[%s2260_s5 + $0x16d8] sm:$0xff]  ;;  %v1329_v46 = vadd.f32 %v1328_v34, %v899_v37  ;;  %v903_v47 = vld [vmem:[%s2260_s5 + $0x16e0] sm:$0xff]  ;;  %v904_v48 = vld [vmem:[%s2260_s5 + $0x16e8] sm:$0xff]  ;;  %v1458_v50 = vadd.f32 %v1457_v38, %v900_v41  ;;  %v1587_v51 = vadd.f32 %v1586_v39, %v901_v42 }
 0x130   : > { %v905_v49 = vld [vmem:[%s2260_s5 + $0x16f0] sm:$0xff]  ;;  %v1716_v52 = vadd.f32 %v1715_v40, %v902_v43  ;;  %v906_v53 = vld [vmem:[%s2260_s5 + $0x16f8] sm:$0xff]  ;;  %v907_v54 = vld [vmem:[%s2260_s5 + $0x1700] sm:$0xff]  ;;  %v1072_v56 = vadd.f32 %v1071_v44, %v903_v47  ;;  %v1201_v57 = vadd.f32 %v1200_v45, %v904_v48 }
 0x131   : > { %v908_v55 = vld [vmem:[%s2260_s5 + $0x1708] sm:$0xff]  ;;  %v1330_v58 = vadd.f32 %v1329_v46, %v905_v49  ;;  %v909_v59 = vld [vmem:[%s2260_s5 + $0x1710] sm:$0xff]  ;;  %v910_v60 = vld [vmem:[%s2260_s5 + $0x1718] sm:$0xff]  ;;  %v1459_v62 = vadd.f32 %v1458_v50, %v906_v53  ;;  %v1588_v63 = vadd.f32 %v1587_v51, %v907_v54 }
 0x132   : > { %v911_v61 = vld [vmem:[%s2260_s5 + $0x1720] sm:$0xff]  ;;  %v1717_v0 = vadd.f32 %v1716_v52, %v908_v55  ;;  %v912_v1 = vld [vmem:[%s2260_s5 + $0x1728] sm:$0xff]  ;;  %v913_v2 = vld [vmem:[%s2260_s5 + $0x1730] sm:$0xff]  ;;  %v1073_v4 = vadd.f32 %v1072_v56, %v909_v59  ;;  %v1202_v5 = vadd.f32 %v1201_v57, %v910_v60 }
 0x133   : > { %v914_v3 = vld [vmem:[%s2260_s5 + $0x1738] sm:$0xff]  ;;  %v1331_v6 = vadd.f32 %v1330_v58, %v911_v61  ;;  %v915_v7 = vld [vmem:[%s2260_s5 + $0x1740] sm:$0xff]  ;;  %v916_v8 = vld [vmem:[%s2260_s5 + $0x1748] sm:$0xff]  ;;  %v1460_v10 = vadd.f32 %v1459_v62, %v912_v1  ;;  %v1589_v11 = vadd.f32 %v1588_v63, %v913_v2 }
 0x134   : > { %v917_v9 = vld [vmem:[%s2260_s5 + $0x1750] sm:$0xff]  ;;  %v1718_v12 = vadd.f32 %v1717_v0, %v914_v3  ;;  %v918_v13 = vld [vmem:[%s2260_s5 + $0x1758] sm:$0xff]  ;;  %v919_v14 = vld [vmem:[%s2260_s5 + $0x1760] sm:$0xff]  ;;  %v1074_v16 = vadd.f32 %v1073_v4, %v915_v7  ;;  %v1203_v17 = vadd.f32 %v1202_v5, %v916_v8 }
 0x135   : > { %v920_v15 = vld [vmem:[%s2260_s5 + $0x1768] sm:$0xff]  ;;  %v1332_v18 = vadd.f32 %v1331_v6, %v917_v9  ;;  %v921_v19 = vld [vmem:[%s2260_s5 + $0x1770] sm:$0xff]  ;;  %v922_v20 = vld [vmem:[%s2260_s5 + $0x1778] sm:$0xff]  ;;  %v1461_v22 = vadd.f32 %v1460_v10, %v918_v13  ;;  %v1590_v23 = vadd.f32 %v1589_v11, %v919_v14 }
 0x136   : > { %v923_v21 = vld [vmem:[%s2260_s5 + $0x1780] sm:$0xff]  ;;  %v1719_v24 = vadd.f32 %v1718_v12, %v920_v15  ;;  %v924_v25 = vld [vmem:[%s2260_s5 + $0x1788] sm:$0xff]  ;;  %v925_v26 = vld [vmem:[%s2260_s5 + $0x1790] sm:$0xff]  ;;  %v1075_v28 = vadd.f32 %v1074_v16, %v921_v19  ;;  %v1204_v29 = vadd.f32 %v1203_v17, %v922_v20 }
 0x137   : > { %v926_v27 = vld [vmem:[%s2260_s5 + $0x1798] sm:$0xff]  ;;  %v1333_v30 = vadd.f32 %v1332_v18, %v923_v21  ;;  %v927_v31 = vld [vmem:[%s2260_s5 + $0x17a0] sm:$0xff]  ;;  %v928_v32 = vld [vmem:[%s2260_s5 + $0x17a8] sm:$0xff]  ;;  %v1462_v34 = vadd.f32 %v1461_v22, %v924_v25  ;;  %v1591_v35 = vadd.f32 %v1590_v23, %v925_v26 }
 0x138   : > { %v929_v33 = vld [vmem:[%s2260_s5 + $0x17b0] sm:$0xff]  ;;  %v1720_v36 = vadd.f32 %v1719_v24, %v926_v27  ;;  %v930_v37 = vld [vmem:[%s2260_s5 + $0x17b8] sm:$0xff]  ;;  %v931_v38 = vld [vmem:[%s2260_s5 + $0x17c0] sm:$0xff]  ;;  %v1076_v40 = vadd.f32 %v1075_v28, %v927_v31  ;;  %v1205_v41 = vadd.f32 %v1204_v29, %v928_v32 }
 0x139   : > { %v932_v39 = vld [vmem:[%s2260_s5 + $0x17c8] sm:$0xff]  ;;  %v1334_v42 = vadd.f32 %v1333_v30, %v929_v33  ;;  %v933_v43 = vld [vmem:[%s2260_s5 + $0x17d0] sm:$0xff]  ;;  %v934_v44 = vld [vmem:[%s2260_s5 + $0x17d8] sm:$0xff]  ;;  %v1463_v46 = vadd.f32 %v1462_v34, %v930_v37  ;;  %v1592_v47 = vadd.f32 %v1591_v35, %v931_v38  ;;  %v2134_v30 = vmov 1966171168  }
 0x13a   : > { %v935_v45 = vld [vmem:[%s2260_s5 + $0x17e0] sm:$0xff]  ;;  %v1721_v48 = vadd.f32 %v1720_v36, %v932_v39  ;;  %v936_v49 = vld [vmem:[%s2260_s5 + $0x17e8] sm:$0xff]  ;;  %v937_v50 = vld [vmem:[%s2260_s5 + $0x17f0] sm:$0xff]  ;;  %v1077_v52 = vadd.f32 %v1076_v40, %v933_v43  ;;  %v1206_v53 = vadd.f32 %v1205_v41, %v934_v44  ;;  %v1798_v31 = vunpack.c.l.s4 %v2134_v30 }
 0x13b   : > { %v938_v51 = vld [vmem:[%s2260_s5 + $0x17f8] sm:$0xff]  ;;  %v1335_v54 = vadd.f32 %v1334_v42, %v935_v45  ;;  %v939_v55 = vld [vmem:[%s2260_s5 + $0x1800] sm:$0xff]  ;;  %v940_v56 = vld [vmem:[%s2260_s5 + $0x1808] sm:$0xff]  ;;  %v1464_v58 = vadd.f32 %v1463_v46, %v936_v49  ;;  %v1593_v59 = vadd.f32 %v1592_v47, %v937_v50  ;;  %v1800_v35 = vlaneseq }
 0x13c   : > { %v941_v57 = vld [vmem:[%s2260_s5 + $0x1810] sm:$0xff]  ;;  %v1722_v60 = vadd.f32 %v1721_v48, %v938_v51  ;;  %v942_v61 = vld [vmem:[%s2260_s5 + $0x1818] sm:$0xff]  ;;  %v943_v62 = vld [vmem:[%s2260_s5 + $0x1820] sm:$0xff]  ;;  %v1078_v0 = vadd.f32 %v1077_v52, %v939_v55  ;;  %v1207_v1 = vadd.f32 %v1206_v53, %v940_v56  ;;  %v1799_v45 = vunpack.c.0.s8 %v1798_v31 }
 0x13d   : > { %v944_v63 = vld [vmem:[%s2260_s5 + $0x1828] sm:$0xff]  ;;  %v1336_v2 = vadd.f32 %v1335_v54, %v941_v57  ;;  %v945_v3 = vld [vmem:[%s2260_s5 + $0x1830] sm:$0xff]  ;;  %v946_v4 = vld [vmem:[%s2260_s5 + $0x1838] sm:$0xff]  ;;  %v1465_v6 = vadd.f32 %v1464_v58, %v942_v61  ;;  %v1594_v7 = vadd.f32 %v1593_v59, %v943_v62  ;;  %v1801_v49 = vshrl.u32 %v1800_v35, 7 }
 0x13e   : > { %v947_v5 = vld [vmem:[%s2260_s5 + $0x1840] sm:$0xff]  ;;  %v1723_v8 = vadd.f32 %v1722_v60, %v944_v63  ;;  %v948_v9 = vld [vmem:[%s2260_s5 + $0x1848] sm:$0xff]  ;;  %v949_v10 = vld [vmem:[%s2260_s5 + $0x1850] sm:$0xff]  ;;  %v1079_v12 = vadd.f32 %v1078_v0, %v945_v3  ;;  %v1208_v13 = vadd.f32 %v1207_v1, %v946_v4  ;;  %vm1837_vm0 = vcmp.lt.s32.totalorder %v1800_v35, 768 }
 0x13f   : > { %v950_v11 = vld [vmem:[%s2260_s5 + $0x1858] sm:$0xff]  ;;  %v1337_v14 = vadd.f32 %v1336_v2, %v947_v5  ;;  %v1466_v15 = vadd.f32 %v1465_v6, %v948_v9  ;;  %v1595_v16 = vadd.f32 %v1594_v7, %v949_v10  ;;  %v1802_v62 = vsub.s32 %v1799_v45, %v1801_v49 }
 0x140   : > { %v1724_v17 = vadd.f32 %v1723_v8, %v950_v11  ;;  %v1746_v18 = vrot.slane %v1079_v12, 4  ;;  %v1752_v19 = vrot.slane %v1208_v13, 4 }
 0x141   : > { %v1758_v20 = vrot.slane %v1337_v14, 4  ;;  %v1764_v21 = vrot.slane %v1466_v15, 4  ;;  %v1770_v22 = vrot.slane %v1595_v16, 4 }
 0x142   : > { %v1776_v23 = vrot.slane %v1724_v17, 4  ;;  %v1747_v24 = vadd.f32 %v1746_v18, %v1079_v12  ;;  %v1753_v25 = vadd.f32 %v1752_v19, %v1208_v13 }
 0x143   : > { %v1759_v26 = vadd.f32 %v1758_v20, %v1337_v14  ;;  %v1765_v27 = vadd.f32 %v1764_v21, %v1466_v15  ;;  %v1771_v28 = vadd.f32 %v1770_v22, %v1595_v16 }
 0x144   : > { %v1777_v29 = vadd.f32 %v1776_v23, %v1724_v17  ;;  %v1748_v32 = vrot.slane %v1747_v24, 2  ;;  %v1754_v33 = vrot.slane %v1753_v25, 2 }
 0x145   : > { %v1760_v34 = vrot.slane %v1759_v26, 2  ;;  %v1766_v36 = vrot.slane %v1765_v27, 2  ;;  %v1772_v37 = vrot.slane %v1771_v28, 2 }
 0x146   : > { %v1778_v38 = vrot.slane %v1777_v29, 2  ;;  %v1749_v39 = vadd.f32 %v1748_v32, %v1747_v24  ;;  %v1755_v40 = vadd.f32 %v1754_v33, %v1753_v25 }
 0x147   : > { %v1761_v41 = vadd.f32 %v1760_v34, %v1759_v26  ;;  %v1767_v42 = vadd.f32 %v1766_v36, %v1765_v27  ;;  %v1773_v43 = vadd.f32 %v1772_v37, %v1771_v28 }
 0x148   : > { %v1779_v44 = vadd.f32 %v1778_v38, %v1777_v29  ;;  %v1750_v46 = vrot.slane %v1749_v39, 1  ;;  %v1756_v47 = vrot.slane %v1755_v40, 1 }
 0x149   : > { %v1762_v48 = vrot.slane %v1761_v41, 1  ;;  %v1768_v50 = vrot.slane %v1767_v42, 1  ;;  %v1774_v51 = vrot.slane %v1773_v43, 1 }
 0x14a   : > { %v1780_v52 = vrot.slane %v1779_v44, 1  ;;  %v1751_v53 = vadd.f32 %v1750_v46, %v1749_v39  ;;  %v1757_v54 = vadd.f32 %v1756_v47, %v1755_v40 }
 0x14b   : > { %v1763_v55 = vadd.f32 %v1762_v48, %v1761_v41  ;;  %v1769_v56 = vadd.f32 %v1768_v50, %v1767_v42  ;;  %v1775_v57 = vadd.f32 %v1774_v51, %v1773_v43 }
 0x14c   : > { %v1781_v58 = vadd.f32 %v1780_v52, %v1779_v44  ;;  %v1782_v59 = vmul.f32 2.0, %v1751_v53  ;;  %v1783_v60 = vmul.f32 2.0, %v1757_v54 }
 0x14d   : > { %v1784_v61 = vmul.f32 2.0, %v1763_v55  ;;  %v1785_v63 = vmul.f32 2.0, %v1769_v56  ;;  %v1786_v0 = vmul.f32 2.0, %v1775_v57 }
 0x14e   : > { %v1787_v1 = vmul.f32 2.0, %v1781_v58  ;;  %v1794_v2 = vcombine.low %v1782_v59, %v1783_v60 }
 0x14f   : > { %v1795_v3 = vcombine.low %v1784_v61, %v1785_v63 }
 0x150   : > { %v1796_v4 = vcombine.low %v1786_v0, %v1787_v1  ;;  %v1803_v5 = vrot.slane %v1794_v2, %v1802_v62 }
 0x151   : > { %v1810_v6 = vrot.slane %v1795_v3, %v1802_v62 }
 0x152   : > { %v1817_v7 = vrot.slane %v1796_v4, %v1802_v62 }
 0x153   : > { %v1818_v8 = vcombine.low %v1803_v5, %v1810_v6 }
 0x154   : > { %v1832_v9 = vrot.slane %v1817_v7, %v1802_v62 }
 0x155   : > { %v1825_v10 = vrot.slane %v1818_v8, %v1802_v62 }
 0x157   : > { %v1833_v11 = vcombine.low %v1825_v10, %v1832_v9 }
 0x159   : > { %1839 = vst.msk [vmem:[%s151_s28] sm:$0x3f] %vm1837_vm0, %v1833_v11 }
 0x15a   : > { %2059 = shalt.err (!%p2056_p3)
}
 0x15b   : > { %s2060_s23 = scalar_lea.hbm %s3051_s13, 96  ;;  %s2064_s27 = scalar_lea.hbm %s3101_s1, 192 }
 0x15c   : > { %p2061_p5 = scmp.ne.s32.totalorder %s3051_s13, %s2060_s23  ;;  %p2065_p12 = scmp.lt.u32.totalorder %s3051_s13, %s3101_s1 }
 0x15d   : > { %p2066_p2 = scmp.lt.u32.totalorder %s2064_s27, %s2060_s23  ;;  %p2068_p8 = scmp.lt.u32.totalorder %s2060_s23, %s3051_s13 }
 0x15e   : > { %p2062_p6 = pnand %p2061_p5, %p3108_p9 }
 0x15f   : > { %p2067_p4 = por %p2066_p2, %p2065_p12 }
 0x160   : > { %p2063_p7 = pneg %p2062_p6 }
 0x161   : > { %p2069_p11 = por %p2068_p8, %p2067_p4 }
 0x163   : > { %p2070_p0 = pnand %p2069_p11, %p2063_p7 }
 0x165   : > { %2073 = shalt.err (!%p2070_p0)
}
 0x166   : > { %1952 = dma.vmem_to_hbm [thread:$0]  (%p3108_p9), %s3053_s30, 96, %s3051_s13, %s1841_s15  }
 0x167 PF: > { %s1867_s4 = sand.u32 1, %s2108_s6   ;;  %p3109_p10 = scmp.ne.s32.totalorder %s3106_s21, 0 }
 0x168   : > { %p3110_p13 = scmp.ge.s32.totalorder %s2128_s11, 2  ;;  %s1868_s5 = scalar_lea.sflag [#allocation5], %s1867_s4 }
 0x16a   : > { %p1959_p1 = pnand %p3110_p13, %p3109_p10 }
 0x16c   : > { %2103 = dma.done.wait (!%p1959_p1), %s1868_s5, 96  }
 0x16d   : > { %2105 = vsyncadd (!%p1959_p1), %s1868_s5, 4294967200  ;;  %s17_s11 = sadd.s32 1, %s2128_s11   ;;  %s3111_s6 = smov %s2112_s7 }
 0x16e   : > { %p14_p3 = scmp.ge.s32.totalorder %s17_s11, 4   ;;  %s3112_s7 = smov %s2116_s8 }
 0x16f   : > { %s3113_s8 = smov %s2202_s20  ;;  %s3114_s9 = smov %s2124_s10 }
 0x170   : > { %s3115_s10 = smov %s3117_s14  ;;  %16 = sbr.rel (!%p14_p3) target bundleno = 6 (0x6), region = 77 }
 0x177   :  { %1873 = vsyncpa [#allocation4], 1 }
 0x178   :  { %1875 = vsyncpa [#allocation4 + $0x1], 1 }
 0x179   :  { %1876 = vsyncpa [#allocation5], 1 }
 0x17a   :  { %1878 = vsyncpa [#allocation5 + $0x1], 1 }

</bundles_post_ra>
